<compile_context>
chip_gen: v6e
topology: v6e:2x2x1
jax: 0.10.0
libtpu: 0.0.40
codegen_flags: <defaults>
</compile_context>

<pallas_src>
import functools

import jax
import jax.numpy as jnp
from jax.experimental import pallas as pl
from jax.experimental.pallas import tpu as pltpu

_FEAT = 512        # stand-in backbone feature width (matches the 512*2 head input)
_PAD_OUT = 128     # lane-dense padded output width


def _round_up(x, m):
    return ((x + m - 1) // m) * m


def dual_model_kernel(x1_ref, x2_ref,              # [tb, Cpad, HW] f32
                      wb_ref, bb_ref,              # [Cpad, 512] f32, [1, 512] f32
                      w1a_ref, w1b_ref, b1_ref,    # [512, 256] bf16 x2, [1, 256] f32
                      w2_ref, b2_ref,              # [256, 128] bf16,    [1, 128] f32
                      w3_ref, b3_ref,              # [128, 128] bf16,    [1, 128] f32
                      out_ref):                    # [tb, 128] bf16
    hw = x1_ref.shape[2]
    inv_hw = 1.0 / float(hw)

    def backbone(x_ref):
        # Global average pool over the spatial axis, in-kernel and in f32
        # (XLU cross-lane reduce + VPU scale), then a tiny aligned projection.
        pooled = jnp.sum(x_ref[...], axis=2) * inv_hw            # [tb, Cpad] f32
        f = jnp.dot(pooled, wb_ref[...],
                    preferred_element_type=jnp.float32) + bb_ref[...]
        return jnp.maximum(f, 0.0).astype(w1a_ref.dtype)         # [tb, 512] bf16

    f1 = backbone(x1_ref)
    f2 = backbone(x2_ref)

    # Head layer 1: concat(f1, f2) @ w1 == f1 @ w1a + f2 @ w1b  (concat-free)
    h = (jnp.dot(f1, w1a_ref[...], preferred_element_type=jnp.float32)
         + jnp.dot(f2, w1b_ref[...], preferred_element_type=jnp.float32)
         + b1_ref[...])
    h = jnp.maximum(h, 0.0).astype(w2_ref.dtype)

    # Head layer 2
    h = jnp.dot(h, w2_ref[...], preferred_element_type=jnp.float32) + b2_ref[...]
    h = jnp.maximum(h, 0.0).astype(w3_ref.dtype)

    # Head layer 3 (zero-padded to 128 output lanes; sliced outside the kernel)
    out = jnp.dot(h, w3_ref[...], preferred_element_type=jnp.float32) + b3_ref[...]
    out_ref[...] = out.astype(out_ref.dtype)


def prepare_params(params):
    """One-time weight preprocessing, hoisted out of the per-call forward."""
    cdt = jnp.bfloat16
    c = params["wb"].shape[0]
    cpad = _round_up(max(c, 8), 8)                   # sublane-aligned channel pad
    num_classes = params["w3"].shape[1]

    wb = jnp.zeros((cpad, _FEAT), jnp.float32).at[:c, :].set(params["wb"])
    w3 = jnp.zeros((params["w3"].shape[0], _PAD_OUT), jnp.float32)
    w3 = w3.at[:, :num_classes].set(params["w3"]).astype(cdt)
    b3 = jnp.zeros((1, _PAD_OUT), jnp.float32).at[:, :num_classes].set(params["b3"])

    return {
        "wb": wb,                                    # [Cpad, 512] f32 (tiny, stays f32)
        "bb": params["bb"].astype(jnp.float32),      # [1, 512]    f32
        "w1a": params["w1"][:_FEAT, :].astype(cdt),  # [512, 256]  bf16
        "w1b": params["w1"][_FEAT:, :].astype(cdt),  # [512, 256]  bf16
        "b1": params["b1"].astype(jnp.float32),      # [1, 256]    f32
        "w2": params["w2"].astype(cdt),              # [256, 128]  bf16
        "b2": params["b2"].astype(jnp.float32),      # [1, 128]    f32
        "w3": w3,                                    # [128, 128]  bf16 (padded)
        "b3": b3,                                    # [1, 128]    f32  (padded)
    }


@functools.partial(jax.jit, static_argnames=("num_classes",))
def my_dual_model(image1, image2, prep, num_classes=5):
    """image1/image2: [B, C, H, W] float32 (NCHW). Returns [B, num_classes] f32."""
    B, C, H, W = image1.shape
    HW = H * W
    cpad = prep["wb"].shape[0]

    # Batch tiling: tile is a multiple of 16 (bf16 sublane pack), capped at 512,
    # and at most ~half the padded batch so the grid has >= 2 "parallel" steps
    # (v7x megacore) whenever the batch is big enough.
    b_pad = _round_up(B, 16)
    tb = min(512, _round_up(max(16, b_pad // 2), 16))
    b_pad = _round_up(b_pad, tb)
    grid = (b_pad // tb,)

    # Per-call activation prep only: reshape + zero-pad batch/channel dims.
    x1 = image1.reshape(B, C, HW)
    x2 = image2.reshape(B, C, HW)
    pad = ((0, b_pad - B), (0, cpad - C), (0, 0))
    if b_pad != B or cpad != C:
        x1 = jnp.pad(x1, pad)
        x2 = jnp.pad(x2, pad)

    img_spec = lambda: pl.BlockSpec((tb, cpad, HW), lambda i: (i, 0, 0))
    const2 = lambda shape: pl.BlockSpec(shape, lambda i: (0, 0))

    weight_bytes = sum(int(v.size) * v.dtype.itemsize for v in prep.values())
    flops = (2 * b_pad * cpad * HW                    # two in-kernel GAPs
             + 2 * 2 * b_pad * cpad * _FEAT           # two backbone projections
             + 2 * b_pad * (2 * _FEAT) * 256          # head layer 1 (1024-wide concat)
             + 2 * b_pad * 256 * 128                  # head layer 2
             + 2 * b_pad * 128 * _PAD_OUT)            # head layer 3
    bytes_accessed = 2 * b_pad * cpad * HW * 4 + weight_bytes + b_pad * _PAD_OUT * 2

    # Scoped VMEM: double-buffered image tiles x2 inputs + weights + output tile.
    img_block = tb * cpad * HW * 4
    out_block = tb * _PAD_OUT * 2
    vmem_need = 2 * 2 * img_block + 2 * weight_bytes + 2 * out_block
    vmem_limit = int(min(max(2 * vmem_need, 16 * 1024 * 1024), 32 * 1024 * 1024))

    out_padded = pl.pallas_call(
        dual_model_kernel,
        out_shape=jax.ShapeDtypeStruct((b_pad, _PAD_OUT), jnp.bfloat16),
        grid=grid,
        in_specs=[
            img_spec(), img_spec(),
            const2((cpad, _FEAT)), const2((1, _FEAT)),
            const2((_FEAT, 256)), const2((_FEAT, 256)), const2((1, 256)),
            const2((256, 128)), const2((1, 128)),
            const2((128, _PAD_OUT)), const2((1, _PAD_OUT)),
        ],
        out_specs=pl.BlockSpec((tb, _PAD_OUT), lambda i: (i, 0)),
        compiler_params=pltpu.CompilerParams(
            dimension_semantics=("parallel",),
            vmem_limit_bytes=vmem_limit),
        cost_estimate=pl.CostEstimate(flops=flops, transcendentals=0,
                                      bytes_accessed=bytes_accessed),
    )(x1, x2, prep["wb"], prep["bb"], prep["w1a"], prep["w1b"], prep["b1"],
      prep["w2"], prep["b2"], prep["w3"], prep["b3"])

    return out_padded[:B, :num_classes].astype(jnp.float32)


def _reference(image1, image2, params):
    """Pure-JAX f32 reference implementing the module semantics (with stand-in backbone)."""
    def backbone(img):
        pooled = jnp.mean(img, axis=(2, 3))                              # GAP -> [B, C]
        return jnp.maximum(pooled @ params["wb"] + params["bb"], 0.0)    # Linear + ReLU

    f1, f2 = backbone(image1), backbone(image2)
    x = jnp.concatenate([f1, f2], axis=1)
    h = jnp.maximum(x @ params["w1"] + params["b1"], 0.0)
    h = jnp.maximum(h @ params["w2"] + params["b2"], 0.0)
    return h @ params["w3"] + params["b3"]


def _linear_init(key, fan_in, fan_out):
    """Deterministic PyTorch-Linear-style uniform init (U(-1/sqrt(fan_in), +))."""
    kw, kb = jax.random.split(key)
    bound = 1.0 / jnp.sqrt(float(fan_in))
    w = jax.random.uniform(kw, (fan_in, fan_out), jnp.float32, -bound, bound)
    b = jax.random.uniform(kb, (1, fan_out), jnp.float32, -bound, bound)
    return w, b


def make_params(key, in_channels, feat_dim=_FEAT, num_classes=5):
    k0, k1, k2, k3 = jax.random.split(key, 4)
    wb, bb = _linear_init(k0, in_channels, feat_dim)      # stand-in backbone proj
    w1, b1 = _linear_init(k1, feat_dim * 2, 256)          # Linear(512*2, 256)
    w2, b2 = _linear_init(k2, 256, 128)                   # Linear(256, 128)
    w3, b3 = _linear_init(k3, 128, num_classes)           # Linear(128, num_classes)
    return {"wb": wb, "bb": bb, "w1": w1, "b1": b1,
            "w2": w2, "b2": b2, "w3": w3, "b3": b3}


if __name__ == "__main__":
    key = jax.random.PRNGKey(0)
    k_img1, k_img2, k_params = jax.random.split(key, 3)

    B, C, H, W = 2, 4, 16, 16
    image1 = jax.random.normal(k_img1, (B, C, H, W), jnp.float32)
    image2 = jax.random.normal(k_img2, (B, C, H, W), jnp.float32)
    params = make_params(k_params, in_channels=C, feat_dim=_FEAT, num_classes=5)

    # One-time weight preparation (hoisted out of the per-call forward).
    prep = prepare_params(params)

    out = my_dual_model(image1, image2, prep, num_classes=5)
    jax.block_until_ready(out)
    assert out.shape == (B, 5), out.shape

    ref = _reference(image1, image2, params)
    max_err = float(jnp.max(jnp.abs(out - ref)))
    assert jnp.allclose(out, ref, atol=2e-2, rtol=2e-2), max_err

    print("KERNEL_OK")
</pallas_src>

<mosaic_0001>
module attributes {stable_mosaic.version = 11 : i64} {
  func.func @dual_model_kernel(%arg0: i32, %arg1: memref<16x8x256xf32, #tpu.memory_space<vmem>>, %arg2: memref<16x8x256xf32, #tpu.memory_space<vmem>>, %arg3: memref<8x512xf32, #tpu.memory_space<vmem>>, %arg4: memref<1x512xf32, #tpu.memory_space<vmem>>, %arg5: memref<512x256xbf16, #tpu.memory_space<vmem>>, %arg6: memref<512x256xbf16, #tpu.memory_space<vmem>>, %arg7: memref<1x256xf32, #tpu.memory_space<vmem>>, %arg8: memref<256x128xbf16, #tpu.memory_space<vmem>>, %arg9: memref<1x128xf32, #tpu.memory_space<vmem>>, %arg10: memref<128x128xbf16, #tpu.memory_space<vmem>>, %arg11: memref<1x128xf32, #tpu.memory_space<vmem>>, %arg12: memref<16x128xbf16, #tpu.memory_space<vmem>>) attributes {dimension_semantics = [#tpu.dimension_semantics<parallel>], iteration_bounds = array<i64: 1>, scalar_prefetch = 0 : i64, scratch_operands = 0 : i64, tpu.core_type = #tpu.core_type<tc>, window_params = [{transform_indices = @transform_0, window_bounds = array<i64: 16, 8, 256>}, {transform_indices = @transform_1, window_bounds = array<i64: 16, 8, 256>}, {pipeline_mode = #tpu.pipeline_mode<synchronous>, transform_indices = @transform_2, window_bounds = array<i64: 8, 512>}, {pipeline_mode = #tpu.pipeline_mode<synchronous>, transform_indices = @transform_3, window_bounds = array<i64: 1, 512>}, {pipeline_mode = #tpu.pipeline_mode<synchronous>, transform_indices = @transform_4, window_bounds = array<i64: 512, 256>}, {pipeline_mode = #tpu.pipeline_mode<synchronous>, transform_indices = @transform_5, window_bounds = array<i64: 512, 256>}, {pipeline_mode = #tpu.pipeline_mode<synchronous>, transform_indices = @transform_6, window_bounds = array<i64: 1, 256>}, {pipeline_mode = #tpu.pipeline_mode<synchronous>, transform_indices = @transform_7, window_bounds = array<i64: 256, 128>}, {pipeline_mode = #tpu.pipeline_mode<synchronous>, transform_indices = @transform_8, window_bounds = array<i64: 1, 128>}, {pipeline_mode = #tpu.pipeline_mode<synchronous>, transform_indices = @transform_9, window_bounds = array<i64: 128, 128>}, {pipeline_mode = #tpu.pipeline_mode<synchronous>, transform_indices = @transform_10, window_bounds = array<i64: 1, 128>}, {transform_indices = @transform_11, window_bounds = array<i64: 16, 128>}]} {
    %c0 = arith.constant 0 : index
    %c0_0 = arith.constant 0 : index
    %c0_1 = arith.constant 0 : index
    %0 = vector.load %arg1[%c0, %c0_0, %c0_1] : memref<16x8x256xf32, #tpu.memory_space<vmem>>, vector<16x8x256xf32>
    %cst = arith.constant dense<0.000000e+00> : vector<16x8xf32>
    %1 = vector.multi_reduction <add>, %0, %cst [2] : vector<16x8x256xf32> to vector<16x8xf32>
    %cst_2 = arith.constant 3.906250e-03 : f32
    %2 = vector.broadcast %cst_2 : f32 to vector<16x8xf32>
    %3 = arith.mulf %1, %2 : vector<16x8xf32>
    %c0_3 = arith.constant 0 : index
    %c0_4 = arith.constant 0 : index
    %4 = vector.load %arg3[%c0_3, %c0_4] : memref<8x512xf32, #tpu.memory_space<vmem>>, vector<8x512xf32>
    %cst_5 = arith.constant dense<0.000000e+00> : vector<16x512xf32>
    %5 = tpu.matmul %3, %4, %cst_5 {dimension_numbers = #tpu.dot_dimension_numbers<[1], [0], [0], [1], [0, 0, 1, 1], [], []>} : vector<16x8xf32>, vector<8x512xf32>, vector<16x512xf32> -> vector<16x512xf32>
    %c0_6 = arith.constant 0 : index
    %c0_7 = arith.constant 0 : index
    %6 = vector.load %arg4[%c0_6, %c0_7] : memref<1x512xf32, #tpu.memory_space<vmem>>, vector<1x512xf32>
    %7 = vector.broadcast %6 : vector<1x512xf32> to vector<16x512xf32>
    %8 = arith.addf %5, %7 : vector<16x512xf32>
    %cst_8 = arith.constant 0.000000e+00 : f32
    %9 = vector.broadcast %cst_8 : f32 to vector<16x512xf32>
    %10 = arith.maximumf %8, %9 : vector<16x512xf32>
    %11 = arith.truncf %10 : vector<16x512xf32> to vector<16x512xbf16>
    %c0_9 = arith.constant 0 : index
    %c0_10 = arith.constant 0 : index
    %c0_11 = arith.constant 0 : index
    %12 = vector.load %arg2[%c0_9, %c0_10, %c0_11] : memref<16x8x256xf32, #tpu.memory_space<vmem>>, vector<16x8x256xf32>
    %cst_12 = arith.constant dense<0.000000e+00> : vector<16x8xf32>
    %13 = vector.multi_reduction <add>, %12, %cst_12 [2] : vector<16x8x256xf32> to vector<16x8xf32>
    %cst_13 = arith.constant 3.906250e-03 : f32
    %14 = vector.broadcast %cst_13 : f32 to vector<16x8xf32>
    %15 = arith.mulf %13, %14 : vector<16x8xf32>
    %c0_14 = arith.constant 0 : index
    %c0_15 = arith.constant 0 : index
    %16 = vector.load %arg3[%c0_14, %c0_15] : memref<8x512xf32, #tpu.memory_space<vmem>>, vector<8x512xf32>
    %cst_16 = arith.constant dense<0.000000e+00> : vector<16x512xf32>
    %17 = tpu.matmul %15, %16, %cst_16 {dimension_numbers = #tpu.dot_dimension_numbers<[1], [0], [0], [1], [0, 0, 1, 1], [], []>} : vector<16x8xf32>, vector<8x512xf32>, vector<16x512xf32> -> vector<16x512xf32>
    %c0_17 = arith.constant 0 : index
    %c0_18 = arith.constant 0 : index
    %18 = vector.load %arg4[%c0_17, %c0_18] : memref<1x512xf32, #tpu.memory_space<vmem>>, vector<1x512xf32>
    %19 = vector.broadcast %18 : vector<1x512xf32> to vector<16x512xf32>
    %20 = arith.addf %17, %19 : vector<16x512xf32>
    %cst_19 = arith.constant 0.000000e+00 : f32
    %21 = vector.broadcast %cst_19 : f32 to vector<16x512xf32>
    %22 = arith.maximumf %20, %21 : vector<16x512xf32>
    %23 = arith.truncf %22 : vector<16x512xf32> to vector<16x512xbf16>
    %c0_20 = arith.constant 0 : index
    %c0_21 = arith.constant 0 : index
    %24 = vector.load %arg5[%c0_20, %c0_21] : memref<512x256xbf16, #tpu.memory_space<vmem>>, vector<512x256xbf16>
    %cst_22 = arith.constant dense<0.000000e+00> : vector<16x256xf32>
    %25 = tpu.matmul %11, %24, %cst_22 {dimension_numbers = #tpu.dot_dimension_numbers<[1], [0], [0], [1], [0, 0, 1, 1], [], []>} : vector<16x512xbf16>, vector<512x256xbf16>, vector<16x256xf32> -> vector<16x256xf32>
    %c0_23 = arith.constant 0 : index
    %c0_24 = arith.constant 0 : index
    %26 = vector.load %arg6[%c0_23, %c0_24] : memref<512x256xbf16, #tpu.memory_space<vmem>>, vector<512x256xbf16>
    %cst_25 = arith.constant dense<0.000000e+00> : vector<16x256xf32>
    %27 = tpu.matmul %23, %26, %cst_25 {dimension_numbers = #tpu.dot_dimension_numbers<[1], [0], [0], [1], [0, 0, 1, 1], [], []>} : vector<16x512xbf16>, vector<512x256xbf16>, vector<16x256xf32> -> vector<16x256xf32>
    %28 = arith.addf %25, %27 : vector<16x256xf32>
    %c0_26 = arith.constant 0 : index
    %c0_27 = arith.constant 0 : index
    %29 = vector.load %arg7[%c0_26, %c0_27] : memref<1x256xf32, #tpu.memory_space<vmem>>, vector<1x256xf32>
    %30 = vector.broadcast %29 : vector<1x256xf32> to vector<16x256xf32>
    %31 = arith.addf %28, %30 : vector<16x256xf32>
    %cst_28 = arith.constant 0.000000e+00 : f32
    %32 = vector.broadcast %cst_28 : f32 to vector<16x256xf32>
    %33 = arith.maximumf %31, %32 : vector<16x256xf32>
    %34 = arith.truncf %33 : vector<16x256xf32> to vector<16x256xbf16>
    %c0_29 = arith.constant 0 : index
    %c0_30 = arith.constant 0 : index
    %35 = vector.load %arg8[%c0_29, %c0_30] : memref<256x128xbf16, #tpu.memory_space<vmem>>, vector<256x128xbf16>
    %cst_31 = arith.constant dense<0.000000e+00> : vector<16x128xf32>
    %36 = tpu.matmul %34, %35, %cst_31 {dimension_numbers = #tpu.dot_dimension_numbers<[1], [0], [0], [1], [0, 0, 1, 1], [], []>} : vector<16x256xbf16>, vector<256x128xbf16>, vector<16x128xf32> -> vector<16x128xf32>
    %c0_32 = arith.constant 0 : index
    %c0_33 = arith.constant 0 : index
    %37 = vector.load %arg9[%c0_32, %c0_33] : memref<1x128xf32, #tpu.memory_space<vmem>>, vector<1x128xf32>
    %38 = vector.broadcast %37 : vector<1x128xf32> to vector<16x128xf32>
    %39 = arith.addf %36, %38 : vector<16x128xf32>
    %cst_34 = arith.constant 0.000000e+00 : f32
    %40 = vector.broadcast %cst_34 : f32 to vector<16x128xf32>
    %41 = arith.maximumf %39, %40 : vector<16x128xf32>
    %42 = arith.truncf %41 : vector<16x128xf32> to vector<16x128xbf16>
    %c0_35 = arith.constant 0 : index
    %c0_36 = arith.constant 0 : index
    %43 = vector.load %arg10[%c0_35, %c0_36] : memref<128x128xbf16, #tpu.memory_space<vmem>>, vector<128x128xbf16>
    %cst_37 = arith.constant dense<0.000000e+00> : vector<16x128xf32>
    %44 = tpu.matmul %42, %43, %cst_37 {dimension_numbers = #tpu.dot_dimension_numbers<[1], [0], [0], [1], [0, 0, 1, 1], [], []>} : vector<16x128xbf16>, vector<128x128xbf16>, vector<16x128xf32> -> vector<16x128xf32>
    %c0_38 = arith.constant 0 : index
    %c0_39 = arith.constant 0 : index
    %45 = vector.load %arg11[%c0_38, %c0_39] : memref<1x128xf32, #tpu.memory_space<vmem>>, vector<1x128xf32>
    %46 = vector.broadcast %45 : vector<1x128xf32> to vector<16x128xf32>
    %47 = arith.addf %44, %46 : vector<16x128xf32>
    %48 = arith.truncf %47 : vector<16x128xf32> to vector<16x128xbf16>
    %c0_40 = arith.constant 0 : index
    %c0_41 = arith.constant 0 : index
    %49 = vector.load %arg12[%c0_40, %c0_41] : memref<16x128xbf16, #tpu.memory_space<vmem>>, vector<16x128xbf16>
    tpu.vector_store %arg12[%c0_40, %c0_41], %48 {strides = array<i32>} : memref<16x128xbf16, #tpu.memory_space<vmem>>, vector<16x128xbf16>,
    return
  }
  func.func @transform_0(%arg0: i32) -> (i32, i32, i32) {
    %c0_i32 = arith.constant 0 : i32
    %c0_i32_0 = arith.constant 0 : i32
    %c0_i32_1 = arith.constant 0 : i32
    return %arg0, %c0_i32, %c0_i32_0 : i32, i32, i32
  }
  func.func @transform_1(%arg0: i32) -> (i32, i32, i32) {
    %c0_i32 = arith.constant 0 : i32
    %c0_i32_0 = arith.constant 0 : i32
    %c0_i32_1 = arith.constant 0 : i32
    return %arg0, %c0_i32, %c0_i32_0 : i32, i32, i32
  }
  func.func @transform_2(%arg0: i32) -> (i32, i32) {
    %c0_i32 = arith.constant 0 : i32
    %c0_i32_0 = arith.constant 0 : i32
    %c0_i32_1 = arith.constant 0 : i32
    return %c0_i32, %c0_i32_0 : i32, i32
  }
  func.func @transform_3(%arg0: i32) -> (i32, i32) {
    %c0_i32 = arith.constant 0 : i32
    %c0_i32_0 = arith.constant 0 : i32
    %c0_i32_1 = arith.constant 0 : i32
    return %c0_i32, %c0_i32_0 : i32, i32
  }
  func.func @transform_4(%arg0: i32) -> (i32, i32) {
    %c0_i32 = arith.constant 0 : i32
    %c0_i32_0 = arith.constant 0 : i32
    %c0_i32_1 = arith.constant 0 : i32
    return %c0_i32, %c0_i32_0 : i32, i32
  }
  func.func @transform_5(%arg0: i32) -> (i32, i32) {
    %c0_i32 = arith.constant 0 : i32
    %c0_i32_0 = arith.constant 0 : i32
    %c0_i32_1 = arith.constant 0 : i32
    return %c0_i32, %c0_i32_0 : i32, i32
  }
  func.func @transform_6(%arg0: i32) -> (i32, i32) {
    %c0_i32 = arith.constant 0 : i32
    %c0_i32_0 = arith.constant 0 : i32
    %c0_i32_1 = arith.constant 0 : i32
    return %c0_i32, %c0_i32_0 : i32, i32
  }
  func.func @transform_7(%arg0: i32) -> (i32, i32) {
    %c0_i32 = arith.constant 0 : i32
    %c0_i32_0 = arith.constant 0 : i32
    %c0_i32_1 = arith.constant 0 : i32
    return %c0_i32, %c0_i32_0 : i32, i32
  }
  func.func @transform_8(%arg0: i32) -> (i32, i32) {
    %c0_i32 = arith.constant 0 : i32
    %c0_i32_0 = arith.constant 0 : i32
    %c0_i32_1 = arith.constant 0 : i32
    return %c0_i32, %c0_i32_0 : i32, i32
  }
  func.func @transform_9(%arg0: i32) -> (i32, i32) {
    %c0_i32 = arith.constant 0 : i32
    %c0_i32_0 = arith.constant 0 : i32
    %c0_i32_1 = arith.constant 0 : i32
    return %c0_i32, %c0_i32_0 : i32, i32
  }
  func.func @transform_10(%arg0: i32) -> (i32, i32) {
    %c0_i32 = arith.constant 0 : i32
    %c0_i32_0 = arith.constant 0 : i32
    %c0_i32_1 = arith.constant 0 : i32
    return %c0_i32, %c0_i32_0 : i32, i32
  }
  func.func @transform_11(%arg0: i32) -> (i32, i32) {
    %c0_i32 = arith.constant 0 : i32
    %c0_i32_0 = arith.constant 0 : i32
    return %arg0, %c0_i32 : i32, i32
  }
}

</mosaic_0001>

<bundles_post_ra>
// kernel: my_dual_model.1
= control target key start
LH: loop header
LB: loop body
LE: loop exit
PB: predicated region body
PF: predicated region fallthrough
CT: control target
= control target key end

     0   :  { %16 = vsyncpa [#allocation3], 0  ;;  %s2542_s17 = smov [#allocation2]   ;;  %s3209_s0 = inlined_call_operand.vmem [shape: f32[16,8,256], index: 0, kind: input, shape index: {}]   ;;  %s3210_s1 = inlined_call_operand.vmem [shape: f32[16,8,256], index: 1, kind: input, shape index: {}]   ;;  %s3211_s2 = inlined_call_operand.vmem [shape: f32[8,512], index: 2, kind: input, shape index: {}]   ;;  %s3212_s3 = inlined_call_operand.vmem [shape: f32[1,512], index: 3, kind: input, shape index: {}]   ;;  %s3213_s4 = inlined_call_operand.vmem [shape: bf16[512,256], index: 4, kind: input, shape index: {}]   ;;  %s3214_s5 = inlined_call_operand.hbm [shape: bf16[512,256], index: 5, kind: input, shape index: {}]   ;;  %s3215_s6 = inlined_call_operand.vmem [shape: f32[1,256], index: 6, kind: input, shape index: {}]   ;;  %s3216_s7 = inlined_call_operand.vmem [shape: bf16[256,128], index: 7, kind: input, shape index: {}]   ;;  %s3217_s8 = inlined_call_operand.vmem [shape: f32[1,128], index: 8, kind: input, shape index: {}]   ;;  %s3218_s9 = inlined_call_operand.vmem [shape: bf16[128,128], index: 9, kind: input, shape index: {}]   ;;  %s3219_s10 = inlined_call_operand.vmem [shape: f32[1,128], index: 10, kind: input, shape index: {}]   ;;  %s3220_s11 = inlined_call_operand.vmem [shape: bf16[16,128], index: 11, kind: output, shape index: {}]  }
   0x1   :  { %s32_s18 = sshll.u32 %s2542_s17, 4  ;;  %s33_s18 = int_to_ptr.vmem [resolvable:$true] %s32_s18 }
   0x2   :  { %s2528_s19 = scalar_lea.vmem %s33_s18, 8192  ;;  %p2533_p1 = scmp.lt.s32.totalorder %s33_s18, %s33_s18 }
   0x3   :  { %p2529_p0 = scmp.ne.s32.totalorder %s33_s18, %s2528_s19  ;;  %p2534_p2 = scmp.lt.s32.totalorder %s2528_s19, %s2528_s19 }
   0x5   :  { %p2535_p3 = por %p2534_p2, %p2533_p1 }
   0x7   :  { %p2536_p4 = pnand %p2535_p3, %p2529_p0 }
   0x9   :  { %2539 = shalt.err (!%p2536_p4)
}
   0xa   :  { %s2543_s20 = smov 128   ;;  %s2544_s21 = smov 8  }
   0xb   :  { %38 = dma.hbm_to_vmem [thread:$0]  %s3214_s5, 8192, %s33_s18, [#allocation3], %s2543_s20, %s2543_s20, %s2544_s21  }
   0xc   :  { %2540 = dma.done.wait [#allocation3], 8192  }
   0xd   :  { %2541 = vsyncadd [#allocation3], 4294959104  ;;  %v57_v0 = vld [vmem:[%s3209_s0 + $0x20] sm:$0xff]  ;;  %v58_v1 = vld [vmem:[%s3209_s0 + $0x28] sm:$0xff]  ;;  %vm257_vm0 = vcmask 1041409   ;;  %vm259_vm1 = vcmask 1042434  }
   0xe   :  { %v53_v2 = vld [vmem:[%s3209_s0] sm:$0xff]  ;;  %v91_v3 = vadd.f32 %v58_v1, %v57_v0  ;;  %v54_v4 = vld [vmem:[%s3209_s0 + $0x8] sm:$0xff]  ;;  %v59_v5 = vld [vmem:[%s3209_s0 + $0x30] sm:$0xff]  ;;  %vm261_vm2 = vcmask 1043459   ;;  %vm263_vm3 = vcmask 1044484   ;;  %vm265_vm4 = vcmask 1045509  }
   0xf   :  { %v60_v6 = vld [vmem:[%s3209_s0 + $0x38] sm:$0xff]  ;;  %v85_v7 = vadd.f32 %v54_v4, %v53_v2  ;;  %v55_v8 = vld [vmem:[%s3209_s0 + $0x10] sm:$0xff]  ;;  %v61_v14 = vld [vmem:[%s3209_s0 + $0x40] sm:$0xff]  ;;  %vm267_vm5 = vcmask 1046534   ;;  %vm269_vm6 = vcmask 1047559   ;;  %vm278_vm7 = vcmask 64512  }
  0x10   :  { %v56_v9 = vld [vmem:[%s3209_s0 + $0x18] sm:$0xff]  ;;  %92 = vadd.xlane.f32.xlu1 %v91_v3  ;;  %v94_v10 = vadd.f32 %v60_v6, %v59_v5  ;;  %v63_v12 = vld [vmem:[%s3209_s0 + $0x50] sm:$0xff]  ;;  %v62_v15 = vld [vmem:[%s3209_s0 + $0x48] sm:$0xff]  ;;  %v2545_v6 = vmov 0.0   ;;  %vm2546_vm8 = vmmov 0  }
  0x11   :  { %86 = vadd.xlane.f32.xlu0 %v85_v7  ;;  %v88_v11 = vadd.f32 %v56_v9, %v55_v8  ;;  %v64_v13 = vld [vmem:[%s3209_s0 + $0x58] sm:$0xff]  ;;  %v97_v17 = vadd.f32 %v62_v15, %v61_v14  ;;  %v71_v18 = vld [vmem:[%s3209_s0 + $0x90] sm:$0xff]  ;;  %v69_v20 = vld [vmem:[%s3209_s0 + $0x80] sm:$0xff]  ;;  %347 = vmatprep.mubr.f32.mxu0 %v2545_v6 }
  0x12   :  { %v100_v16 = vadd.f32 %v64_v13, %v63_v12  ;;  %v72_v19 = vld [vmem:[%s3209_s0 + $0x98] sm:$0xff]  ;;  %v70_v21 = vld [vmem:[%s3209_s0 + $0x88] sm:$0xff]  ;;  %v73_v24 = vld [vmem:[%s3209_s0 + $0xa0] sm:$0xff]  ;;  %424 = vmatprep.mubr.f32.mxu1 %v2545_v6 }
  0x13   :  { %v112_v22 = vadd.f32 %v72_v19, %v71_v18  ;;  %v109_v23 = vadd.f32 %v70_v21, %v69_v20  ;;  %v74_v25 = vld [vmem:[%s3209_s0 + $0xa8] sm:$0xff]  ;;  %v65_v26 = vld [vmem:[%s3209_s0 + $0x60] sm:$0xff]  ;;  %v75_v30 = vld [vmem:[%s3209_s0 + $0xb0] sm:$0xff] }
  0x14   :  { %95 = vadd.xlane.f32.xlu1 %v94_v10  ;;  %v66_v27 = vld [vmem:[%s3209_s0 + $0x68] sm:$0xff]  ;;  %v115_v28 = vadd.f32 %v74_v25, %v73_v24  ;;  %v76_v31 = vld [vmem:[%s3209_s0 + $0xb8] sm:$0xff]  ;;  %v67_v32 = vld [vmem:[%s3209_s0 + $0x70] sm:$0xff] }
  0x15   :  { %89 = vadd.xlane.f32.xlu0 %v88_v11  ;;  %v103_v29 = vadd.f32 %v66_v27, %v65_v26  ;;  %v68_v33 = vld [vmem:[%s3209_s0 + $0x78] sm:$0xff]  ;;  %v118_v34 = vadd.f32 %v76_v31, %v75_v30  ;;  %v79_v36 = vld [vmem:[%s3209_s0 + $0xd0] sm:$0xff]  ;;  %v77_v38 = vld [vmem:[%s3209_s0 + $0xc0] sm:$0xff] }
  0x16   :  { %v106_v35 = vadd.f32 %v68_v33, %v67_v32  ;;  %v80_v37 = vld [vmem:[%s3209_s0 + $0xd8] sm:$0xff]  ;;  %v78_v39 = vld [vmem:[%s3209_s0 + $0xc8] sm:$0xff]  ;;  %v451_v40 = vld [vmem:[%s3210_s1 + $0x10] sm:$0xff] }
  0x17   :  { %v452_v41 = vld [vmem:[%s3210_s1 + $0x18] sm:$0xff]  ;;  %v124_v42 = vadd.f32 %v80_v37, %v79_v36  ;;  %v449_v43 = vld [vmem:[%s3210_s1] sm:$0xff]  ;;  %v450_v44 = vld [vmem:[%s3210_s1 + $0x8] sm:$0xff]  ;;  %v121_v45 = vadd.f32 %v78_v39, %v77_v38  ;;  %v155_v37 = vlaneseq }
  0x18   :  { %101 = vadd.xlane.f32.xlu1 %v100_v16  ;;  %v453_v46 = vld [vmem:[%s3210_s1 + $0x20] sm:$0xff]  ;;  %v454_v47 = vld [vmem:[%s3210_s1 + $0x28] sm:$0xff]  ;;  %v484_v48 = vadd.f32 %v452_v41, %v451_v40  ;;  %v481_v51 = vadd.f32 %v450_v44, %v449_v43  ;;  %v455_v52 = vld [vmem:[%s3210_s1 + $0x30] sm:$0xff] }
  0x19   :  { %98 = vadd.xlane.f32.xlu0 %v97_v17  ;;  %v81_v49 = vld [vmem:[%s3209_s0 + $0xe0] sm:$0xff]  ;;  %v82_v50 = vld [vmem:[%s3209_s0 + $0xe8] sm:$0xff]  ;;  %v456_v53 = vld [vmem:[%s3210_s1 + $0x38] sm:$0xff]  ;;  %v487_v54 = vadd.f32 %v454_v47, %v453_v46  ;;  %v2822_v40 = vshrl.u32 %v155_v37, 7  ;;  %v192_v41 = vand.u32 127, %v155_v37 }
  0x1a   :  { %v83_v55 = vld [vmem:[%s3209_s0 + $0xf0] sm:$0xff]  ;;  %v84_v56 = vld [vmem:[%s3209_s0 + $0xf8] sm:$0xff]  ;;  %v127_v57 = vadd.f32 %v82_v50, %v81_v49  ;;  %v490_v60 = vadd.f32 %v456_v53, %v455_v52  ;;  %v457_v61 = vld [vmem:[%s3210_s1 + $0x40] sm:$0xff] }
  0x1b   :  { %v459_v58 = vld [vmem:[%s3210_s1 + $0x50] sm:$0xff]  ;;  %v460_v59 = vld [vmem:[%s3210_s1 + $0x58] sm:$0xff]  ;;  %v458_v62 = vld [vmem:[%s3210_s1 + $0x48] sm:$0xff]  ;;  %v130_v63 = vadd.f32 %v84_v56, %v83_v55  ;;  %v2825_v44 = vsub.s32 %v192_v41, %v2822_v40 }
  0x1c   :  { %113 = vadd.xlane.f32.xlu1 %v112_v22  ;;  %v150_v0 = vld [vmem:[%s3211_s2 + $0x8] sm:$0xff]  ;;  %v152_v1 = vld [vmem:[%s3211_s2 + $0x18] sm:$0xff]  ;;  %v2751_v2 = vld [vmem:[%s3211_s2] sm:$0xff]  ;;  %v496_v7 = vadd.f32 %v460_v59, %v459_v58  ;;  %v493_v10 = vadd.f32 %v458_v62, %v457_v61 }
  0x1d   :  { %110 = vadd.xlane.f32.xlu0 %v109_v23  ;;  %313 = vmatprep.subr.mxu0 %v150_v0  ;;  %v2756_v3 = vld [vmem:[%s3211_s2 + $0x10] sm:$0xff]  ;;  %v468_v5 = vld [vmem:[%s3210_s1 + $0x98] sm:$0xff]  ;;  %v465_v8 = vld [vmem:[%s3210_s1 + $0x80] sm:$0xff] }
  0x1e   :  { %390 = vmatprep.subr.mxu1 %v152_v1  ;;  %v467_v4 = vld [vmem:[%s3210_s1 + $0x90] sm:$0xff]  ;;  %314 = vmatpush1.msra.mxu0 %v2751_v2  ;;  %v466_v9 = vld [vmem:[%s3210_s1 + $0x88] sm:$0xff]  ;;  %v469_v11 = vld [vmem:[%s3210_s1 + $0xa0] sm:$0xff] }
  0x1f   :  { %391 = vmatpush1.msra.mxu1 %v2756_v3  ;;  %673 = vmatprep.subr.mxu0 %v150_v0  ;;  %v470_v12 = vld [vmem:[%s3210_s1 + $0xa8] sm:$0xff]  ;;  %v508_v13 = vadd.f32 %v468_v5, %v467_v4  ;;  %v461_v14 = vld [vmem:[%s3210_s1 + $0x60] sm:$0xff]  ;;  %v505_v16 = vadd.f32 %v466_v9, %v465_v8  ;;  %v471_v17 = vld [vmem:[%s3210_s1 + $0xb0] sm:$0xff] }
  0x20   :  { %116 = vadd.xlane.f32.xlu1 %v115_v28  ;;  %750 = vmatprep.subr.mxu1 %v152_v1  ;;  %v462_v15 = vld [vmem:[%s3210_s1 + $0x68] sm:$0xff]  ;;  %v472_v18 = vld [vmem:[%s3210_s1 + $0xb8] sm:$0xff]  ;;  %v511_v19 = vadd.f32 %v470_v12, %v469_v11  ;;  %v463_v20 = vld [vmem:[%s3210_s1 + $0x70] sm:$0xff] }
  0x21   :  { %104 = vadd.xlane.f32.xlu0 %v103_v29  ;;  %v464_v21 = vld [vmem:[%s3210_s1 + $0x78] sm:$0xff]  ;;  %v499_v22 = vadd.f32 %v462_v15, %v461_v14  ;;  %v475_v23 = vld [vmem:[%s3210_s1 + $0xd0] sm:$0xff]  ;;  %v514_v25 = vadd.f32 %v472_v18, %v471_v17  ;;  %v473_v26 = vld [vmem:[%s3210_s1 + $0xc0] sm:$0xff] }
  0x22   :  { %v476_v24 = vld [vmem:[%s3210_s1 + $0xd8] sm:$0xff]  ;;  %v474_v27 = vld [vmem:[%s3210_s1 + $0xc8] sm:$0xff]  ;;  %v502_v28 = vadd.f32 %v464_v21, %v463_v20  ;;  %v479_v29 = vld [vmem:[%s3210_s1 + $0xf0] sm:$0xff] }
  0x23   :  { %v480_v30 = vld [vmem:[%s3210_s1 + $0xf8] sm:$0xff]  ;;  %v520_v31 = vadd.f32 %v476_v24, %v475_v23  ;;  %v477_v32 = vld [vmem:[%s3210_s1 + $0xe0] sm:$0xff]  ;;  %v478_v33 = vld [vmem:[%s3210_s1 + $0xe8] sm:$0xff] }
  0x24   :  { %119 = vadd.xlane.f32.xlu1 %v118_v34  ;;  %v517_v34 = vadd.f32 %v474_v27, %v473_v26  ;;  %v523_v36 = vadd.f32 %v478_v33, %v477_v32  ;;  %v2309_v20 = vld [vmem:[#allocation2 + $0x174] ss:$8 sps:$4 sm:$0xff]  }
  0x25   :  { %107 = vadd.xlane.f32.xlu0 %v106_v35  ;;  %v526_v35 = vadd.f32 %v480_v30, %v479_v29 }
  0x28   :  { %125 = vadd.xlane.f32.xlu1 %v124_v42 }
  0x29   :  { %122 = vadd.xlane.f32.xlu0 %v121_v45 }
  0x2c   :  { %485 = vadd.xlane.f32.xlu1 %v484_v48 }
  0x2d   :  { %482 = vadd.xlane.f32.xlu0 %v481_v51 }
  0x30   :  { %488 = vadd.xlane.f32.xlu1 %v487_v54 }
  0x31   :  { %128 = vadd.xlane.f32.xlu0 %v127_v57 }
  0x34   :  { %491 = vadd.xlane.f32.xlu1 %v490_v60 }
  0x35   :  { %131 = vadd.xlane.f32.xlu0 %v130_v63 }
  0x38   :  { %497 = vadd.xlane.f32.xlu1 %v496_v7 }
  0x39   :  { %494 = vadd.xlane.f32.xlu0 %v493_v10 }
  0x3c   :  { %509 = vadd.xlane.f32.xlu1 %v508_v13 }
  0x3d   :  { %506 = vadd.xlane.f32.xlu0 %v505_v16 }
  0x40   :  { %512 = vadd.xlane.f32.xlu1 %v511_v19  ;;  %v2306_v19 = vld [vmem:[#allocation2 + $0x74] ss:$8 sps:$4 sm:$0xff]  }
  0x41   :  { %500 = vadd.xlane.f32.xlu0 %v499_v22 }
  0x44   :  { %515 = vadd.xlane.f32.xlu1 %v514_v25 }
  0x45   :  { %503 = vadd.xlane.f32.xlu0 %v502_v28 }
  0x48   :  { %521 = vadd.xlane.f32.xlu1 %v520_v31 }
  0x49   :  { %518 = vadd.xlane.f32.xlu0 %v517_v34 }
  0x4c   :  { %527 = vadd.xlane.f32.xlu1 %v526_v35 }
  0x4d   :  { %524 = vadd.xlane.f32.xlu0 %v523_v36 }
  0x99   :  { %v93_v38 = vpop.xlane.xlu1 %92 }
  0x9a   :  { %v87_v39 = vpop.xlane.xlu0 %86  ;;  %v135_v49 = vmul.f32 0.00390625, %v93_v38 }
  0x9b   :  { %v133_v45 = vmul.f32 0.00390625, %v87_v39 }
  0x9c   :  { %v204_v55 = vrot.slane %v135_v49, %v2825_v44 }
  0x9d   :  { %v96_v42 = vpop.xlane.xlu1 %95  ;;  %v196_v51 = vrot.slane %v133_v45, %v2825_v44 }
  0x9e   :  { %v90_v43 = vpop.xlane.xlu0 %89  ;;  %v136_v52 = vmul.f32 0.00390625, %v96_v42 }
  0x9f   :  { %v134_v46 = vmul.f32 0.00390625, %v90_v43 }
  0xa0   :  { %v208_v58 = vrot.slane %v136_v52, %v2825_v44 }
  0xa1   :  { %v200_v47 = vrot.slane %v134_v46, %v2825_v44  ;;  %v102_v48 = vpop.xlane.xlu1 %101 }
  0xa2   :  { %v99_v50 = vpop.xlane.xlu0 %98  ;;  %v138_v60 = vmul.f32 0.00390625, %v102_v48 }
  0xa3   :  { %v258_v53 = vsel %vm257_vm0, %v200_v47, %v196_v51  ;;  %v137_v56 = vmul.f32 0.00390625, %v99_v50 }
  0xa4   :  { %v260_v59 = vsel %vm259_vm1, %v204_v55, %v258_v53  ;;  %v216_v4 = vrot.slane %v138_v60, %v2825_v44 }
  0xa5   :  { %v114_v54 = vpop.xlane.xlu1 %113  ;;  %v212_v62 = vrot.slane %v137_v56, %v2825_v44  ;;  %v262_v0 = vsel %vm261_vm2, %v208_v58, %v260_v59 }
  0xa6   :  { %v111_v57 = vpop.xlane.xlu0 %110  ;;  %v142_v16 = vmul.f32 0.00390625, %v114_v54 }
  0xa7   :  { %v264_v7 = vsel %vm263_vm3, %v212_v62, %v262_v0  ;;  %v141_v17 = vmul.f32 0.00390625, %v111_v57 }
  0xa8   :  { %v266_v13 = vsel %vm265_vm4, %v216_v4, %v264_v7  ;;  %v232_v26 = vrot.slane %v142_v16, %v2825_v44 }
  0xa9   :  { %v117_v61 = vpop.xlane.xlu1 %116  ;;  %v228_v27 = vrot.slane %v141_v17, %v2825_v44 }
  0xaa   :  { %v105_v63 = vpop.xlane.xlu0 %104  ;;  %v143_v21 = vmul.f32 0.00390625, %v117_v61 }
  0xab   :  { %v139_v1 = vmul.f32 0.00390625, %v105_v63  ;;  %v271_v34 = vsel %vm257_vm0, %v232_v26, %v228_v27 }
  0xac   :  { %v236_v28 = vrot.slane %v143_v21, %v2825_v44 }
  0xad   :  { %v120_v5 = vpop.xlane.xlu1 %119  ;;  %v220_v8 = vrot.slane %v139_v1, %v2825_v44 }
  0xae   :  { %v108_v9 = vpop.xlane.xlu0 %107  ;;  %v144_v22 = vmul.f32 0.00390625, %v120_v5 }
  0xaf   :  { %v140_v10 = vmul.f32 0.00390625, %v108_v9  ;;  %v268_v15 = vsel %vm267_vm5, %v220_v8, %v266_v13 }
  0xb0   :  { %v240_v29 = vrot.slane %v144_v22, %v2825_v44 }
  0xb1   :  { %v224_v11 = vrot.slane %v140_v10, %v2825_v44  ;;  %v126_v12 = vpop.xlane.xlu1 %125 }
  0xb2   :  { %v123_v14 = vpop.xlane.xlu0 %122  ;;  %v146_v30 = vmul.f32 0.00390625, %v126_v12 }
  0xb3   :  { %v270_v18 = vsel %vm269_vm6, %v224_v11, %v268_v15  ;;  %v145_v24 = vmul.f32 0.00390625, %v123_v14 }
  0xb4   :  { %2077 = vmatmul.mubr.msk.f32.vlgmr.msra.gmra.mxu0 %vm278_vm7, %v270_v18  ;;  %2079 = vmatmul.mubr.msk.f32.vlgmr.msra.gmra.mxu1 %vm278_vm7, %v270_v18  ;;  %v248_v36 = vrot.slane %v146_v30, %v2825_v44 }
  0xb5   :  { %v486_v23 = vpop.xlane.xlu1 %485  ;;  %353 = vmatprep.mubr.f32.mxu0 %v2545_v6  ;;  %430 = vmatprep.mubr.f32.mxu1 %v2545_v6  ;;  %v244_v32 = vrot.slane %v145_v24, %v2825_v44 }
  0xb6   :  { %v483_v25 = vpop.xlane.xlu0 %482  ;;  %674 = vmatpush1.msra.mxu0 %v2751_v2  ;;  %751 = vmatpush1.msra.mxu1 %v2756_v3  ;;  %v272_v3 = vsel %vm259_vm1, %v236_v28, %v271_v34  ;;  %v530_v49 = vmul.f32 0.00390625, %v486_v23  ;;  %v2304_v28 = vld [vmem:[#allocation2 + $0x70] ss:$8 sps:$4 sm:$0xff]  }
  0xb7   :  { %1257 = vmatprep.subr.bf16.mxu0 %v2306_v19  ;;  %1300 = vmatprep.subr.bf16.mxu1 %v2309_v20  ;;  %v273_v35 = vsel %vm261_vm2, %v240_v29, %v272_v3  ;;  %v529_v50 = vmul.f32 0.00390625, %v483_v25  ;;  %v2307_v29 = vld [vmem:[#allocation2 + $0x170] ss:$8 sps:$4 sm:$0xff]  }
  0xb8   :  { %v274_v38 = vsel %vm263_vm3, %v244_v32, %v273_v35  ;;  %v568_v57 = vrot.slane %v530_v49, %v2825_v44  ;;  %v2312_v32 = vld [vmem:[#allocation2 + $0x64] ss:$8 sps:$4 sm:$0xff]  }
  0xb9   :  { %v489_v31 = vpop.xlane.xlu1 %488  ;;  %v275_v46 = vsel %vm265_vm4, %v248_v36, %v274_v38  ;;  %v564_v58 = vrot.slane %v529_v50, %v2825_v44 }
  0xba   :  { %v129_v33 = vpop.xlane.xlu0 %128  ;;  %v531_v52 = vmul.f32 0.00390625, %v489_v31 }
  0xbb   :  { %v147_v2 = vmul.f32 0.00390625, %v129_v33  ;;  %v625_v1 = vsel %vm257_vm0, %v568_v57, %v564_v58  ;;  %v2315_v33 = vld [vmem:[#allocation2 + $0x164] ss:$8 sps:$4 sm:$0xff]   ;;  %v2325_v57 = vld [vmem:[#allocation2 + $0x140] ss:$8 sps:$4 sm:$0xff]  }
  0xbc   :  { %v572_v59 = vrot.slane %v531_v52, %v2825_v44  ;;  %v2319_v52 = vld [vmem:[#allocation2 + $0x150] ss:$8 sps:$4 sm:$0xff]   ;;  %v2330_v58 = vld [vmem:[#allocation2 + $0x34] ss:$8 sps:$4 sm:$0xff]  }
  0xbd   :  { %v492_v37 = vpop.xlane.xlu1 %491  ;;  %v252_v39 = vrot.slane %v147_v2, %v2825_v44 }
  0xbe   :  { %v132_v41 = vpop.xlane.xlu0 %131  ;;  %v532_v53 = vmul.f32 0.00390625, %v492_v37  ;;  %v626_v5 = vsel %vm259_vm1, %v572_v59, %v625_v1  ;;  %v2333_v59 = vld [vmem:[#allocation2 + $0x134] ss:$8 sps:$4 sm:$0xff]   ;;  %v2337_v1 = vld [vmem:[#allocation2 + $0x120] ss:$8 sps:$4 sm:$0xff]  }
  0xbf   :  { %v148_v42 = vmul.f32 0.00390625, %v132_v41  ;;  %v276_v48 = vsel %vm267_vm5, %v252_v39, %v275_v46  ;;  %v2310_v41 = vld [vmem:[#allocation2 + $0x60] ss:$8 sps:$4 sm:$0xff]   ;;  %v2318_v46 = vld [vmem:[#allocation2 + $0x54] ss:$8 sps:$4 sm:$0xff]  }
  0xc0   :  { %v576_v60 = vrot.slane %v532_v53, %v2825_v44 }
  0xc1   :  { %v256_v43 = vrot.slane %v148_v42, %v2825_v44  ;;  %v498_v45 = vpop.xlane.xlu1 %497  ;;  %v2313_v42 = vld [vmem:[#allocation2 + $0x160] ss:$8 sps:$4 sm:$0xff]  }
  0xc2   :  { %v495_v47 = vpop.xlane.xlu0 %494  ;;  %v534_v61 = vmul.f32 0.00390625, %v498_v45  ;;  %v627_v9 = vsel %vm261_vm2, %v576_v60, %v626_v5  ;;  %v2328_v60 = vld [vmem:[#allocation2 + $0x30] ss:$8 sps:$4 sm:$0xff]   ;;  %v2345_v5 = vld [vmem:[#allocation2 + $0x114] ss:$8 sps:$4 sm:$0xff]  }
  0xc3   :  { %v277_v51 = vsel %vm269_vm6, %v256_v43, %v276_v48  ;;  %v533_v55 = vmul.f32 0.00390625, %v495_v47  ;;  %v2321_v47 = vld [vmem:[#allocation2 + $0x154] ss:$8 sps:$4 sm:$0xff]  }
  0xc4   :  { %2078 = vmatmul.mubr.msk.f32.gmra.mxu0 %vm278_vm7, %v277_v51  ;;  %2080 = vmatmul.mubr.msk.f32.gmra.mxu1 %vm278_vm7, %v277_v51  ;;  %v584_v10 = vrot.slane %v534_v61, %v2825_v44  ;;  %v2316_v51 = vld [vmem:[#allocation2 + $0x50] ss:$8 sps:$4 sm:$0xff]  }
  0xc5   :  { %v510_v54 = vpop.xlane.xlu1 %509  ;;  %707 = vmatprep.mubr.f32.mxu0 %v2545_v6  ;;  %784 = vmatprep.mubr.f32.mxu1 %v2545_v6  ;;  %v580_v63 = vrot.slane %v533_v55, %v2825_v44  ;;  %v2327_v55 = vld [vmem:[#allocation2 + $0x144] ss:$8 sps:$4 sm:$0xff]   ;;  %v2331_v61 = vld [vmem:[#allocation2 + $0x130] ss:$8 sps:$4 sm:$0xff]  }
  0xc6   :  { %v507_v56 = vpop.xlane.xlu0 %506  ;;  %v538_v7 = vmul.f32 0.00390625, %v510_v54  ;;  %v2324_v54 = vld [vmem:[#allocation2 + $0x44] ss:$8 sps:$4 sm:$0xff]  }
  0xc7   :  { %v537_v8 = vmul.f32 0.00390625, %v507_v56  ;;  %v628_v13 = vsel %vm263_vm3, %v580_v63, %v627_v9  ;;  %v2339_v63 = vld [vmem:[#allocation2 + $0x124] ss:$8 sps:$4 sm:$0xff]  }
  0xc8   :  { %v600_v18 = vrot.slane %v538_v7, %v2825_v44  ;;  %v629_v21 = vsel %vm265_vm4, %v584_v10, %v628_v13  ;;  %v2340_v7 = vld [vmem:[#allocation2 + $0x10] ss:$8 sps:$4 sm:$0xff]   ;;  %v2348_v9 = vld [vmem:[#allocation2 + $0x4] ss:$8 sps:$4 sm:$0xff]   ;;  %v2354_v13 = vld [vmem:[#allocation2 + $0xf4] ss:$8 sps:$4 sm:$0xff]  }
  0xc9   :  { %v513_v62 = vpop.xlane.xlu1 %512  ;;  %v596_v19 = vrot.slane %v537_v8, %v2825_v44  ;;  %v2343_v8 = vld [vmem:[#allocation2 + $0x110] ss:$8 sps:$4 sm:$0xff]   ;;  %v2351_v10 = vld [vmem:[#allocation2 + $0x104] ss:$8 sps:$4 sm:$0xff]  }
  0xca   :  { %v501_v0 = vpop.xlane.xlu0 %500  ;;  %v539_v11 = vmul.f32 0.00390625, %v513_v62  ;;  %v2336_v62 = vld [vmem:[#allocation2 + $0x24] ss:$8 sps:$4 sm:$0xff]  }
  0xcb   :  { %v535_v4 = vmul.f32 0.00390625, %v501_v0  ;;  %v632_v34 = vsel %vm257_vm0, %v600_v18, %v596_v19  ;;  %v2334_v0 = vld [vmem:[#allocation2 + $0x20] ss:$8 sps:$4 sm:$0xff]   ;;  %v2363_v18 = vld [vmem:[#allocation2 + $0x1e4] ss:$8 sps:$4 sm:$0xff]  }
  0xcc   :  { %v604_v20 = vrot.slane %v539_v11, %v2825_v44  ;;  %v2346_v11 = vld [vmem:[#allocation2] ss:$8 sps:$4 sm:$0xff]  }
  0xcd   :  { %v516_v12 = vpop.xlane.xlu1 %515  ;;  %v588_v14 = vrot.slane %v535_v4, %v2825_v44  ;;  %v2342_v4 = vld [vmem:[#allocation2 + $0x14] ss:$8 sps:$4 sm:$0xff]   ;;  %v2358_v19 = vld [vmem:[#allocation2 + $0xe0] ss:$8 sps:$4 sm:$0xff]  }
  0xce   :  { %v540_v15 = vmul.f32 0.00390625, %v516_v12  ;;  %v504_v16 = vpop.xlane.xlu0 %503  ;;  %v633_v2 = vsel %vm259_vm1, %v604_v20, %v632_v34  ;;  %v2349_v12 = vld [vmem:[#allocation2 + $0x100] ss:$8 sps:$4 sm:$0xff]   ;;  %v2387_v34 = vld [vmem:[#allocation2 + $0x1a4] ss:$8 sps:$4 sm:$0xff]  }
  0xcf   :  { %v536_v17 = vmul.f32 0.00390625, %v504_v16  ;;  %v630_v24 = vsel %vm267_vm5, %v588_v14, %v629_v21  ;;  %v2357_v14 = vld [vmem:[#allocation2 + $0x1f4] ss:$8 sps:$4 sm:$0xff]   ;;  %v2355_v16 = vld [vmem:[#allocation2 + $0x1f0] ss:$8 sps:$4 sm:$0xff]  }
  0xd0   :  { %v608_v25 = vrot.slane %v540_v15, %v2825_v44  ;;  %v2352_v15 = vld [vmem:[#allocation2 + $0xf0] ss:$8 sps:$4 sm:$0xff]   ;;  %v2361_v20 = vld [vmem:[#allocation2 + $0x1e0] ss:$8 sps:$4 sm:$0xff]  }
  0xd1   :  { %v592_v22 = vrot.slane %v536_v17, %v2825_v44  ;;  %v522_v23 = vpop.xlane.xlu1 %521  ;;  %v2360_v17 = vld [vmem:[#allocation2 + $0xe4] ss:$8 sps:$4 sm:$0xff]   ;;  %v2364_v21 = vld [vmem:[#allocation2 + $0xd0] ss:$8 sps:$4 sm:$0xff]  }
  0xd2   :  { %v519_v26 = vpop.xlane.xlu0 %518  ;;  %v542_v27 = vmul.f32 0.00390625, %v522_v23  ;;  %v634_v36 = vsel %vm261_vm2, %v608_v25, %v633_v2  ;;  %v2367_v23 = vld [vmem:[#allocation2 + $0x1d0] ss:$8 sps:$4 sm:$0xff]   ;;  %v2372_v25 = vld [vmem:[#allocation2 + $0xc4] ss:$8 sps:$4 sm:$0xff]  }
  0xd3   :  { %v631_v30 = vsel %vm269_vm6, %v592_v22, %v630_v24  ;;  %v541_v31 = vmul.f32 0.00390625, %v519_v26  ;;  %v2366_v22 = vld [vmem:[#allocation2 + $0xd4] ss:$8 sps:$4 sm:$0xff]   ;;  %v2375_v26 = vld [vmem:[#allocation2 + $0x1c4] ss:$8 sps:$4 sm:$0xff]  }
  0xd4   :  { %2081 = vmatmul.mubr.msk.f32.vlgmr.msra.gmra.mxu0 %vm278_vm7, %v631_v30  ;;  %2083 = vmatmul.mubr.msk.f32.vlgmr.msra.gmra.mxu1 %vm278_vm7, %v631_v30  ;;  %v616_v37 = vrot.slane %v542_v27, %v2825_v44  ;;  %v2369_v24 = vld [vmem:[#allocation2 + $0x1d4] ss:$8 sps:$4 sm:$0xff]   ;;  %v2370_v27 = vld [vmem:[#allocation2 + $0xc0] ss:$8 sps:$4 sm:$0xff]  }
  0xd5   :  { %v612_v3 = vrot.slane %v541_v31, %v2825_v44  ;;  %v528_v35 = vpop.xlane.xlu1 %527  ;;  %713 = vmatprep.mubr.f32.mxu0 %v2545_v6  ;;  %790 = vmatprep.mubr.f32.mxu1 %v2545_v6  ;;  %v2381_v30 = vld [vmem:[#allocation2 + $0x1b4] ss:$8 sps:$4 sm:$0xff]   ;;  %v2376_v31 = vld [vmem:[#allocation2 + $0xb0] ss:$8 sps:$4 sm:$0xff]   ;;  %v2382_v2 = vld [vmem:[#allocation2 + $0xa0] ss:$8 sps:$4 sm:$0xff]  }
  0xd6   :  { %v525_v38 = vpop.xlane.xlu0 %524  ;;  %v544_v39 = vmul.f32 0.00390625, %v528_v35  ;;  %1258 = vmatpush1.bf16.msra.mxu0 %v2304_v28  ;;  %1301 = vmatpush1.bf16.msra.mxu1 %v2307_v29  ;;  %v2373_v28 = vld [vmem:[#allocation2 + $0x1c0] ss:$8 sps:$4 sm:$0xff]   ;;  %v2378_v29 = vld [vmem:[#allocation2 + $0xb4] ss:$8 sps:$4 sm:$0xff]  }
  0xd7   :  { %v635_v43 = vsel %vm263_vm3, %v612_v3, %v634_v36  ;;  %v543_v45 = vmul.f32 0.00390625, %v525_v38  ;;  %1259 = vmatprep.subr.bf16.mxu0 %v2312_v32  ;;  %1302 = vmatprep.subr.bf16.mxu1 %v2315_v33  ;;  %v2379_v32 = vld [vmem:[#allocation2 + $0x1b0] ss:$8 sps:$4 sm:$0xff]   ;;  %v2384_v33 = vld [vmem:[#allocation2 + $0xa4] ss:$8 sps:$4 sm:$0xff]  }
  0xd8   :  { %v624_v48 = vrot.slane %v544_v39, %v2825_v44  ;;  %v636_v50 = vsel %vm265_vm4, %v616_v37, %v635_v43  ;;  %v2385_v3 = vld [vmem:[#allocation2 + $0x1a0] ss:$8 sps:$4 sm:$0xff]   ;;  %v2390_v35 = vld [vmem:[#allocation2 + $0x94] ss:$8 sps:$4 sm:$0xff]   ;;  %v2388_v37 = vld [vmem:[#allocation2 + $0x90] ss:$8 sps:$4 sm:$0xff]  }
  0xd9   :  { %v620_v49 = vrot.slane %v543_v45, %v2825_v44  ;;  %v2322_v44 = vld [vmem:[#allocation2 + $0x40] ss:$8 sps:$4 sm:$0xff]   ;;  %v2393_v36 = vld [vmem:[#allocation2 + $0x194] ss:$8 sps:$4 sm:$0xff]   ;;  %v2391_v38 = vld [vmem:[#allocation2 + $0x190] ss:$8 sps:$4 sm:$0xff]  }
  0xda   :  { %1260 = vmatpush1.bf16.msra.mxu0 %v2310_v41  ;;  %1303 = vmatpush1.bf16.msra.mxu1 %v2313_v42  ;;  %v2396_v39 = vld [vmem:[#allocation2 + $0x84] ss:$8 sps:$4 sm:$0xff]   ;;  %v2394_v42 = vld [vmem:[#allocation2 + $0x80] ss:$8 sps:$4 sm:$0xff]   ;;  %v2402_v45 = vld [vmem:[%s3213_s4 + $0x74] ss:$8 sps:$4 sm:$0xff]  }
  0xdb   :  { %v637_v53 = vsel %vm267_vm5, %v620_v49, %v636_v50  ;;  %1261 = vmatprep.subr.bf16.mxu0 %v2318_v46  ;;  %1304 = vmatprep.subr.bf16.mxu1 %v2321_v47  ;;  %v2399_v41 = vld [vmem:[#allocation2 + $0x184] ss:$8 sps:$4 sm:$0xff]   ;;  %v2397_v43 = vld [vmem:[#allocation2 + $0x180] ss:$8 sps:$4 sm:$0xff]   ;;  %v2405_v46 = vld [vmem:[%s3213_s4 + $0x174] ss:$8 sps:$4 sm:$0xff]  }
  0xdc   :  { %v638_v56 = vsel %vm269_vm6, %v624_v48, %v637_v53  ;;  %v157_v47 = vsub.s32 0, %v2822_v40  ;;  %v165_v48 = vsub.s32 2, %v2822_v40  ;;  %v153_v49 = vld [vmem:[%s3212_s3] sm:$0xf] }
  0xdd   :  { %2082 = vmatmul.mubr.msk.f32.gmra.mxu0 %vm278_vm7, %v638_v56  ;;  %2084 = vmatmul.mubr.msk.f32.gmra.mxu1 %vm278_vm7, %v638_v56 }
  0xde   :  { %1262 = vmatpush1.bf16.msra.mxu0 %v2316_v51  ;;  %1305 = vmatpush1.bf16.msra.mxu1 %v2319_v52  ;;  %v158_v50 = vrot.slane %v153_v49, %v157_v47  ;;  %v166_v51 = vrot.slane %v153_v49, %v165_v48 }
  0xdf   :  { %1263 = vmatprep.subr.bf16.mxu0 %v2324_v54  ;;  %1306 = vmatprep.subr.bf16.mxu1 %v2327_v55 }
  0xe2   :  { %1264 = vmatpush1.bf16.msra.mxu0 %v2322_v44  ;;  %1307 = vmatpush1.bf16.msra.mxu1 %v2325_v57 }
  0xe3   :  { %1265 = vmatprep.subr.bf16.mxu0 %v2330_v58  ;;  %1308 = vmatprep.subr.bf16.mxu1 %v2333_v59 }
  0xe6   :  { %1266 = vmatpush1.bf16.msra.mxu0 %v2328_v60  ;;  %1309 = vmatpush1.bf16.msra.mxu1 %v2331_v61 }
  0xe7   :  { %1267 = vmatprep.subr.bf16.mxu0 %v2336_v62  ;;  %1310 = vmatprep.subr.bf16.mxu1 %v2339_v63 }
  0xea   :  { %1268 = vmatpush1.bf16.msra.mxu0 %v2334_v0  ;;  %1311 = vmatpush1.bf16.msra.mxu1 %v2337_v1 }
  0xeb   :  { %1269 = vmatprep.subr.bf16.mxu0 %v2342_v4  ;;  %1312 = vmatprep.subr.bf16.mxu1 %v2345_v5 }
  0xee   :  { %1270 = vmatpush1.bf16.msra.mxu0 %v2340_v7  ;;  %1313 = vmatpush1.bf16.msra.mxu1 %v2343_v8 }
  0xef   :  { %1271 = vmatprep.subr.bf16.mxu0 %v2348_v9  ;;  %1314 = vmatprep.subr.bf16.mxu1 %v2351_v10  ;;  %v161_v10 = vsub.s32 1, %v2822_v40 }
  0xf2   :  { %1272 = vmatpush1.bf16.msra.mxu0 %v2346_v11  ;;  %1315 = vmatpush1.bf16.msra.mxu1 %v2349_v12  ;;  %v169_v11 = vsub.s32 3, %v2822_v40  ;;  %v2516_v40 = vld [vmem:[%s3218_s9 + $0x18] sm:$0xff]  }
  0xf3   :  { %1273 = vmatprep.subr.bf16.mxu0 %v2354_v13  ;;  %1316 = vmatprep.subr.bf16.mxu1 %v2357_v14  ;;  %v162_v14 = vrot.slane %v153_v49, %v161_v10 }
  0xf6   :  { %1274 = vmatpush2.bf16.msra.mxu0 %v2352_v15  ;;  %1317 = vmatpush2.bf16.msra.mxu1 %v2355_v16  ;;  %v170_v15 = vrot.slane %v153_v49, %v169_v11  ;;  %v2435_v11 = vld [vmem:[%s3213_s4 + $0x124] ss:$8 sps:$4 sm:$0xff]  }
  0xf7   :  { %1275 = vmatprep.subr.bf16.mxu0 %v2360_v17  ;;  %1318 = vmatprep.subr.bf16.mxu1 %v2363_v18 }
  0xfa   :  { %1276 = vmatpush2.bf16.msra.mxu0 %v2358_v19  ;;  %1319 = vmatpush2.bf16.msra.mxu1 %v2361_v20 }
  0xfb   :  { %1277 = vmatprep.subr.bf16.mxu0 %v2366_v22  ;;  %1320 = vmatprep.subr.bf16.mxu1 %v2369_v24 }
  0xfe   :  { %1278 = vmatpush2.bf16.msra.mxu0 %v2364_v21  ;;  %1321 = vmatpush2.bf16.msra.mxu1 %v2367_v23 }
  0xff   :  { %1279 = vmatprep.subr.bf16.mxu0 %v2372_v25  ;;  %1322 = vmatprep.subr.bf16.mxu1 %v2375_v26 }
 0x102   :  { %1280 = vmatpush2.bf16.msra.mxu0 %v2370_v27  ;;  %1323 = vmatpush2.bf16.msra.mxu1 %v2373_v28 }
 0x103   :  { %1281 = vmatprep.subr.bf16.mxu0 %v2378_v29  ;;  %1324 = vmatprep.subr.bf16.mxu1 %v2381_v30 }
 0x106   :  { %1282 = vmatpush2.bf16.msra.mxu0 %v2376_v31  ;;  %1325 = vmatpush2.bf16.msra.mxu1 %v2379_v32 }
 0x107   :  { %1283 = vmatprep.subr.bf16.mxu0 %v2384_v33  ;;  %1326 = vmatprep.subr.bf16.mxu1 %v2387_v34 }
 0x10a   :  { %1284 = vmatpush2.bf16.msra.mxu0 %v2382_v2  ;;  %1327 = vmatpush2.bf16.msra.mxu1 %v2385_v3 }
 0x10b   :  { %1285 = vmatprep.subr.bf16.mxu0 %v2390_v35  ;;  %1328 = vmatprep.subr.bf16.mxu1 %v2393_v36 }
 0x10e   :  { %1286 = vmatpush2.bf16.msra.mxu0 %v2388_v37  ;;  %1329 = vmatpush2.bf16.msra.mxu1 %v2391_v38 }
 0x10f   :  { %1287 = vmatprep.subr.bf16.mxu0 %v2396_v39  ;;  %1330 = vmatprep.subr.bf16.mxu1 %v2399_v41 }
 0x112   :  { %1288 = vmatpush2.bf16.msra.mxu0 %v2394_v42  ;;  %1331 = vmatpush2.bf16.msra.mxu1 %v2397_v43  ;;  %v2400_v43 = vld [vmem:[%s3213_s4 + $0x70] ss:$8 sps:$4 sm:$0xff]  }
 0x113   :  { %1663 = vmatprep.subr.bf16.mxu0 %v2402_v45  ;;  %1706 = vmatprep.subr.bf16.mxu1 %v2405_v46  ;;  %v2403_v45 = vld [vmem:[%s3213_s4 + $0x170] ss:$8 sps:$4 sm:$0xff]  }
 0x174   :  { %v349_v52 = vpop.f32.mrf.mxu0  ;;  %v426_v53 = vpop.f32.mrf.mxu1 }
 0x175   :  { %v350_v54 = vadd.f32 %v349_v52, %v158_v50  ;;  %v427_v55 = vadd.f32 %v426_v53, %v166_v51  ;;  %v2411_v52 = vld [vmem:[%s3213_s4 + $0x164] ss:$8 sps:$4 sm:$0xff]  }
 0x176   :  { %v351_v56 = vpop.f32.mrf.mxu0  ;;  %v428_v44 = vpop.f32.mrf.mxu1 }
 0x177   :  { %v437_v61 = vmax.f32 %v350_v54, 0.0  ;;  %v439_v62 = vmax.f32 %v427_v55, 0.0  ;;  %v352_v30 = vadd.f32 %v351_v56, %v162_v14  ;;  %v429_v31 = vadd.f32 %v428_v44, %v170_v15  ;;  %v2406_v55 = vld [vmem:[%s3213_s4 + $0x60] ss:$8 sps:$4 sm:$0xff]   ;;  %v2414_v44 = vld [vmem:[%s3213_s4 + $0x54] ss:$8 sps:$4 sm:$0xff]  }
 0x178   :  { %v2409_v56 = vld [vmem:[%s3213_s4 + $0x160] ss:$8 sps:$4 sm:$0xff]  }
 0x179   :  { %v438_v46 = vmax.f32 %v352_v30, 0.0  ;;  %v440_v48 = vmax.f32 %v429_v31, 0.0  ;;  %v2462_v30 = vld [vmem:[%s3213_s4 + $0xd4] ss:$8 sps:$4 sm:$0xff]  }
 0x17a   :  { %v2465_v31 = vld [vmem:[%s3213_s4 + $0x1d4] ss:$8 sps:$4 sm:$0xff]  }
 0x184   :  { %v355_v57 = vpop.f32.mrf.mxu0  ;;  %v432_v58 = vpop.f32.mrf.mxu1 }
 0x185   :  { %v356_v59 = vadd.f32 %v355_v57, %v158_v50  ;;  %v433_v60 = vadd.f32 %v432_v58, %v166_v51  ;;  %v2417_v57 = vld [vmem:[%s3213_s4 + $0x154] ss:$8 sps:$4 sm:$0xff]   ;;  %v2412_v58 = vld [vmem:[%s3213_s4 + $0x50] ss:$8 sps:$4 sm:$0xff]  }
 0x186   :  { %v357_v5 = vpop.f32.mrf.mxu0  ;;  %v434_v7 = vpop.f32.mrf.mxu1 }
 0x187   :  { %v441_v63 = vmax.f32 %v356_v59, 0.0  ;;  %v443_v0 = vmax.f32 %v433_v60, 0.0  ;;  %v358_v22 = vadd.f32 %v357_v5, %v162_v14  ;;  %v435_v23 = vadd.f32 %v434_v7, %v170_v15  ;;  %v2415_v59 = vld [vmem:[%s3213_s4 + $0x150] ss:$8 sps:$4 sm:$0xff]   ;;  %v2420_v60 = vld [vmem:[%s3213_s4 + $0x44] ss:$8 sps:$4 sm:$0xff]  }
 0x188   :  { %v2429_v5 = vld [vmem:[%s3213_s4 + $0x134] ss:$8 sps:$4 sm:$0xff]   ;;  %v2424_v7 = vld [vmem:[%s3213_s4 + $0x30] ss:$8 sps:$4 sm:$0xff]  }
 0x189   :  { %v2916_v1 = vpack.c.bf16 %v441_v63, %v437_v61  ;;  %v2918_v4 = vpack.c.bf16 %v443_v0, %v439_v62  ;;  %v442_v36 = vmax.f32 %v358_v22, 0.0  ;;  %v444_v37 = vmax.f32 %v435_v23, 0.0  ;;  %v2423_v61 = vld [vmem:[%s3213_s4 + $0x144] ss:$8 sps:$4 sm:$0xff]   ;;  %v2418_v62 = vld [vmem:[%s3213_s4 + $0x40] ss:$8 sps:$4 sm:$0xff]  }
 0x18a   :  { %v2421_v63 = vld [vmem:[%s3213_s4 + $0x140] ss:$8 sps:$4 sm:$0xff]   ;;  %v2426_v0 = vld [vmem:[%s3213_s4 + $0x34] ss:$8 sps:$4 sm:$0xff]  }
 0x18b   :  { %v446_v53 = vpack.c.bf16 %v442_v36, %v438_v46  ;;  %v448_v54 = vpack.c.bf16 %v444_v37, %v440_v48  ;;  %v2450_v22 = vld [vmem:[%s3213_s4 + $0xf4] ss:$8 sps:$4 sm:$0xff]  }
 0x18c   :  { %v2453_v23 = vld [vmem:[%s3213_s4 + $0x1f4] ss:$8 sps:$4 sm:$0xff]  }
 0x18d   :  { %v2474_v36 = vld [vmem:[%s3213_s4 + $0xb4] ss:$8 sps:$4 sm:$0xff]  }
 0x18e   :  { %v2477_v37 = vld [vmem:[%s3213_s4 + $0x1b4] ss:$8 sps:$4 sm:$0xff]  }
 0x18f   :  { %v2486_v46 = vld [vmem:[%s3213_s4 + $0x94] ss:$8 sps:$4 sm:$0xff]  }
 0x190   :  { %v2489_v48 = vld [vmem:[%s3213_s4 + $0x194] ss:$8 sps:$4 sm:$0xff]  }
 0x194   :  { %v709_v8 = vpop.f32.mrf.mxu0  ;;  %v786_v9 = vpop.f32.mrf.mxu1 }
 0x195   :  { %v710_v24 = vadd.f32 %v709_v8, %v158_v50  ;;  %v787_v25 = vadd.f32 %v786_v9, %v166_v51  ;;  %v2427_v8 = vld [vmem:[%s3213_s4 + $0x130] ss:$8 sps:$4 sm:$0xff]   ;;  %v2432_v9 = vld [vmem:[%s3213_s4 + $0x24] ss:$8 sps:$4 sm:$0xff]  }
 0x196   :  { %v711_v12 = vpop.f32.mrf.mxu0  ;;  %v788_v13 = vpop.f32.mrf.mxu1 }
 0x197   :  { %v712_v18 = vadd.f32 %v711_v12, %v162_v14  ;;  %v789_v19 = vadd.f32 %v788_v13, %v170_v15  ;;  %v797_v38 = vmax.f32 %v710_v24, 0.0  ;;  %v799_v39 = vmax.f32 %v787_v25, 0.0  ;;  %v2430_v12 = vld [vmem:[%s3213_s4 + $0x20] ss:$8 sps:$4 sm:$0xff]   ;;  %v2448_v24 = vld [vmem:[%s3213_s4 + $0xf0] ss:$8 sps:$4 sm:$0xff]  }
 0x198   :  { %v2433_v13 = vld [vmem:[%s3213_s4 + $0x120] ss:$8 sps:$4 sm:$0xff]   ;;  %v2451_v25 = vld [vmem:[%s3213_s4 + $0x1f0] ss:$8 sps:$4 sm:$0xff]  }
 0x199   :  { %v798_v34 = vmax.f32 %v712_v18, 0.0  ;;  %v800_v2 = vmax.f32 %v789_v19, 0.0  ;;  %v2444_v18 = vld [vmem:[%s3213_s4 + $0x4] ss:$8 sps:$4 sm:$0xff]  }
 0x19a   :  { %v2447_v19 = vld [vmem:[%s3213_s4 + $0x104] ss:$8 sps:$4 sm:$0xff]  }
 0x19d   :  { %v715_v16 = vpop.f32.mrf.mxu0  ;;  %v792_v17 = vpop.f32.mrf.mxu1 }
 0x19e   :  { %v716_v20 = vadd.f32 %v715_v16, %v158_v50  ;;  %v793_v21 = vadd.f32 %v792_v17, %v166_v51  ;;  %v2408_v51 = vld [vmem:[%s3213_s4 + $0x64] ss:$8 sps:$4 sm:$0xff]   ;;  %v2436_v16 = vld [vmem:[%s3213_s4 + $0x10] ss:$8 sps:$4 sm:$0xff]  }
 0x19f   :  { %v717_v26 = vpop.f32.mrf.mxu0  ;;  %v794_v27 = vpop.f32.mrf.mxu1  ;;  %v2439_v17 = vld [vmem:[%s3213_s4 + $0x110] ss:$8 sps:$4 sm:$0xff]  }
 0x1a0   :  { %v718_v28 = vadd.f32 %v717_v26, %v162_v14  ;;  %v795_v29 = vadd.f32 %v794_v27, %v170_v15  ;;  %v801_v32 = vmax.f32 %v716_v20, 0.0  ;;  %v803_v33 = vmax.f32 %v793_v21, 0.0  ;;  %v2438_v14 = vld [vmem:[%s3213_s4 + $0x14] ss:$8 sps:$4 sm:$0xff]   ;;  %v2442_v20 = vld [vmem:[%s3213_s4] ss:$8 sps:$4 sm:$0xff]  }
 0x1a1   :  { %v2441_v15 = vld [vmem:[%s3213_s4 + $0x114] ss:$8 sps:$4 sm:$0xff]   ;;  %v2445_v21 = vld [vmem:[%s3213_s4 + $0x100] ss:$8 sps:$4 sm:$0xff]   ;;  %v2456_v26 = vld [vmem:[%s3213_s4 + $0xe4] ss:$8 sps:$4 sm:$0xff]  }
 0x1a2   :  { %v802_v3 = vmax.f32 %v718_v28, 0.0  ;;  %v804_v35 = vmax.f32 %v795_v29, 0.0  ;;  %v805_v49 = vpack.c.bf16 %v801_v32, %v797_v38  ;;  %v807_v50 = vpack.c.bf16 %v803_v33, %v799_v39  ;;  %v2459_v27 = vld [vmem:[%s3213_s4 + $0x1e4] ss:$8 sps:$4 sm:$0xff]   ;;  %v2454_v28 = vld [vmem:[%s3213_s4 + $0xe0] ss:$8 sps:$4 sm:$0xff]  }
 0x1a3   :  { %v2457_v29 = vld [vmem:[%s3213_s4 + $0x1e0] ss:$8 sps:$4 sm:$0xff]   ;;  %v2460_v32 = vld [vmem:[%s3213_s4 + $0xd0] ss:$8 sps:$4 sm:$0xff]  }
 0x1a4   :  { %v806_v41 = vpack.c.bf16 %v802_v3, %v798_v34  ;;  %v808_v42 = vpack.c.bf16 %v804_v35, %v800_v2  ;;  %v2463_v33 = vld [vmem:[%s3213_s4 + $0x1d0] ss:$8 sps:$4 sm:$0xff]   ;;  %v2468_v34 = vld [vmem:[%s3213_s4 + $0xc4] ss:$8 sps:$4 sm:$0xff]   ;;  %v2466_v3 = vld [vmem:[%s3213_s4 + $0xc0] ss:$8 sps:$4 sm:$0xff]  }
 0x1a5   :  { %v2471_v2 = vld [vmem:[%s3213_s4 + $0x1c4] ss:$8 sps:$4 sm:$0xff]   ;;  %v2469_v35 = vld [vmem:[%s3213_s4 + $0x1c0] ss:$8 sps:$4 sm:$0xff]   ;;  %v2472_v38 = vld [vmem:[%s3213_s4 + $0xb0] ss:$8 sps:$4 sm:$0xff]  }
 0x1a6   :  { %1289 = vmatprep.mubr.bf16.mxu0 %v806_v41  ;;  %1332 = vmatprep.mubr.bf16.mxu1 %v808_v42  ;;  %v2475_v39 = vld [vmem:[%s3213_s4 + $0x1b0] ss:$8 sps:$4 sm:$0xff]   ;;  %v2480_v41 = vld [vmem:[%s3213_s4 + $0xa4] ss:$8 sps:$4 sm:$0xff]  }
 0x1a7   :  { %1290 = vmatmul.mubr.bf16.vlgmr.msra.gmra.mxu0 %v805_v49  ;;  %1333 = vmatmul.mubr.bf16.vlgmr.msra.gmra.mxu1 %v807_v50  ;;  %v2483_v42 = vld [vmem:[%s3213_s4 + $0x1a4] ss:$8 sps:$4 sm:$0xff]   ;;  %v2484_v49 = vld [vmem:[%s3213_s4 + $0x90] ss:$8 sps:$4 sm:$0xff]  }
 0x1a8   :  { %1664 = vmatpush1.bf16.msra.mxu0 %v2400_v43  ;;  %1707 = vmatpush1.bf16.msra.mxu1 %v2403_v45  ;;  %v2478_v43 = vld [vmem:[%s3213_s4 + $0xa0] ss:$8 sps:$4 sm:$0xff]   ;;  %v2487_v50 = vld [vmem:[%s3213_s4 + $0x190] ss:$8 sps:$4 sm:$0xff]  }
 0x1a9   :  { %1695 = vmatprep.mubr.bf16.mxu0 %v446_v53  ;;  %1738 = vmatprep.mubr.bf16.mxu1 %v448_v54  ;;  %v2481_v45 = vld [vmem:[%s3213_s4 + $0x1a0] ss:$8 sps:$4 sm:$0xff]  }
 0x1aa   :  { %1665 = vmatprep.subr.bf16.mxu0 %v2408_v51  ;;  %1708 = vmatprep.subr.bf16.mxu1 %v2411_v52  ;;  %v2492_v51 = vld [vmem:[%s3213_s4 + $0x84] ss:$8 sps:$4 sm:$0xff]   ;;  %v2490_v53 = vld [vmem:[%s3213_s4 + $0x80] ss:$8 sps:$4 sm:$0xff]  }
 0x1ab   :  { %v2495_v52 = vld [vmem:[%s3213_s4 + $0x184] ss:$8 sps:$4 sm:$0xff]   ;;  %v2493_v54 = vld [vmem:[%s3213_s4 + $0x180] ss:$8 sps:$4 sm:$0xff]  }
 0x1ac   :  { %1666 = vmatpush1.bf16.msra.mxu0 %v2406_v55  ;;  %1709 = vmatpush1.bf16.msra.mxu1 %v2409_v56  ;;  %v2496_v55 = vld [vmem:[%s3216_s7 + $0x78] sm:$0xff]  }
 0x1ad   :  { %1667 = vmatprep.subr.bf16.mxu0 %v2414_v44  ;;  %1710 = vmatprep.subr.bf16.mxu1 %v2417_v57  ;;  %v2497_v56 = vld [vmem:[%s3216_s7 + $0x38] sm:$0xff]   ;;  %v2498_v44 = vld [vmem:[%s3216_s7 + $0x70] sm:$0xff]   ;;  %v2501_v57 = vld [vmem:[%s3216_s7 + $0x28] sm:$0xff]  }
 0x1b0   :  { %1668 = vmatpush1.bf16.msra.mxu0 %v2412_v58  ;;  %1711 = vmatpush1.bf16.msra.mxu1 %v2415_v59  ;;  %v2502_v58 = vld [vmem:[%s3216_s7 + $0x60] sm:$0xff]  }
 0x1b1   :  { %1669 = vmatprep.subr.bf16.mxu0 %v2420_v60  ;;  %1712 = vmatprep.subr.bf16.mxu1 %v2423_v61  ;;  %v2503_v59 = vld [vmem:[%s3216_s7 + $0x20] sm:$0xff]   ;;  %v2504_v60 = vld [vmem:[%s3216_s7 + $0x58] sm:$0xff]  }
 0x1b2   :  { %v2505_v61 = vld [vmem:[%s3216_s7 + $0x18] sm:$0xff]  }
 0x1b4   :  { %1670 = vmatpush1.bf16.msra.mxu0 %v2418_v62  ;;  %1713 = vmatpush1.bf16.msra.mxu1 %v2421_v63  ;;  %v2506_v62 = vld [vmem:[%s3216_s7 + $0x50] sm:$0xff]  }
 0x1b5   :  { %1671 = vmatprep.subr.bf16.mxu0 %v2426_v0  ;;  %1714 = vmatprep.subr.bf16.mxu1 %v2429_v5  ;;  %v2507_v63 = vld [vmem:[%s3216_s7 + $0x10] sm:$0xff]   ;;  %v2508_v0 = vld [vmem:[%s3216_s7 + $0x48] sm:$0xff]  }
 0x1b6   :  { %v2509_v5 = vld [vmem:[%s3216_s7 + $0x8] sm:$0xff]  }
 0x1b8   :  { %1672 = vmatpush1.bf16.msra.mxu0 %v2424_v7  ;;  %1715 = vmatpush1.bf16.msra.mxu1 %v2427_v8  ;;  %v2510_v7 = vld [vmem:[%s3216_s7 + $0x40] sm:$0xff]  }
 0x1b9   :  { %1673 = vmatprep.subr.bf16.mxu0 %v2432_v9  ;;  %1716 = vmatprep.subr.bf16.mxu1 %v2435_v11  ;;  %v2511_v8 = vld [vmem:[%s3216_s7] sm:$0xff]   ;;  %v2512_v9 = vld [vmem:[%s3218_s9 + $0x38] sm:$0xff]   ;;  %v2513_v11 = vld [vmem:[%s3218_s9 + $0x30] sm:$0xff]  }
 0x1bc   :  { %1674 = vmatpush1.bf16.msra.mxu0 %v2430_v12  ;;  %1717 = vmatpush1.bf16.msra.mxu1 %v2433_v13  ;;  %v2514_v12 = vld [vmem:[%s3218_s9 + $0x28] sm:$0xff]   ;;  %v2515_v13 = vld [vmem:[%s3218_s9 + $0x20] sm:$0xff]  }
 0x1bd   :  { %1675 = vmatprep.subr.bf16.mxu0 %v2438_v14  ;;  %1718 = vmatprep.subr.bf16.mxu1 %v2441_v15 }
 0x1c0   :  { %1676 = vmatpush1.bf16.msra.mxu0 %v2436_v16  ;;  %1719 = vmatpush1.bf16.msra.mxu1 %v2439_v17 }
 0x1c1   :  { %1677 = vmatprep.subr.bf16.mxu0 %v2444_v18  ;;  %1720 = vmatprep.subr.bf16.mxu1 %v2447_v19 }
 0x1c4   :  { %1678 = vmatpush1.bf16.msra.mxu0 %v2442_v20  ;;  %1721 = vmatpush1.bf16.msra.mxu1 %v2445_v21 }
 0x1c5   :  { %1679 = vmatprep.subr.bf16.mxu0 %v2450_v22  ;;  %1722 = vmatprep.subr.bf16.mxu1 %v2453_v23 }
 0x1c8   :  { %1680 = vmatpush2.bf16.msra.mxu0 %v2448_v24  ;;  %1723 = vmatpush2.bf16.msra.mxu1 %v2451_v25 }
 0x1c9   :  { %1681 = vmatprep.subr.bf16.mxu0 %v2456_v26  ;;  %1724 = vmatprep.subr.bf16.mxu1 %v2459_v27 }
 0x1cc   :  { %1682 = vmatpush2.bf16.msra.mxu0 %v2454_v28  ;;  %1725 = vmatpush2.bf16.msra.mxu1 %v2457_v29 }
 0x1cd   :  { %1683 = vmatprep.subr.bf16.mxu0 %v2462_v30  ;;  %1726 = vmatprep.subr.bf16.mxu1 %v2465_v31  ;;  %v1749_v30 = vld [vmem:[%s3215_s6] sm:$0x3] }
 0x1d0   :  { %1684 = vmatpush2.bf16.msra.mxu0 %v2460_v32  ;;  %1727 = vmatpush2.bf16.msra.mxu1 %v2463_v33 }
 0x1d1   :  { %1685 = vmatprep.subr.bf16.mxu0 %v2468_v34  ;;  %1728 = vmatprep.subr.bf16.mxu1 %v2471_v2 }
 0x1d4   :  { %1686 = vmatpush2.bf16.msra.mxu0 %v2466_v3  ;;  %1729 = vmatpush2.bf16.msra.mxu1 %v2469_v35  ;;  %v1758_v3 = vrot.slane %v1749_v30, %v161_v10 }
 0x1d5   :  { %1687 = vmatprep.subr.bf16.mxu0 %v2474_v36  ;;  %1730 = vmatprep.subr.bf16.mxu1 %v2477_v37  ;;  %v1754_v37 = vrot.slane %v1749_v30, %v157_v47  ;;  %v2517_v47 = vld [vmem:[%s3218_s9 + $0x10] sm:$0xff]  }
 0x1d8   :  { %1688 = vmatpush2.bf16.msra.mxu0 %v2472_v38  ;;  %1731 = vmatpush2.bf16.msra.mxu1 %v2475_v39 }
 0x1d9   :  { %1689 = vmatprep.subr.bf16.mxu0 %v2480_v41  ;;  %1732 = vmatprep.subr.bf16.mxu1 %v2483_v42 }
 0x1dc   :  { %1690 = vmatpush2.bf16.msra.mxu0 %v2478_v43  ;;  %1733 = vmatpush2.bf16.msra.mxu1 %v2481_v45 }
 0x1dd   :  { %1691 = vmatprep.subr.bf16.mxu0 %v2486_v46  ;;  %1734 = vmatprep.subr.bf16.mxu1 %v2489_v48 }
 0x1e0   :  { %1692 = vmatpush2.bf16.msra.mxu0 %v2484_v49  ;;  %1735 = vmatpush2.bf16.msra.mxu1 %v2487_v50 }
 0x1e1   :  { %1693 = vmatprep.subr.bf16.mxu0 %v2492_v51  ;;  %1736 = vmatprep.subr.bf16.mxu1 %v2495_v52 }
 0x1e4   :  { %1694 = vmatpush2.bf16.msra.mxu0 %v2490_v53  ;;  %1737 = vmatpush2.bf16.msra.mxu1 %v2493_v54 }
 0x1e5   :  { %2279 = vmatprep.subr.bf16.mxu1 %v2545_v6  ;;  %2248 = vmatprep.subr.bf16.mxu0 %v2496_v55  ;;  %v2518_v55 = vld [vmem:[%s3218_s9 + $0x8] sm:$0xff]  }
 0x1e7   :  { %1696 = vmatmul.mubr.bf16.vlgmr.msra.gmra.mxu0 %v2916_v1  ;;  %1739 = vmatmul.mubr.bf16.vlgmr.msra.gmra.mxu1 %v2918_v4  ;;  %v2499_v1 = vld [vmem:[%s3216_s7 + $0x30] sm:$0xff]   ;;  %v2500_v4 = vld [vmem:[%s3216_s7 + $0x68] sm:$0xff]  }
 0x1e8   :  { %2249 = vmatpush3.bf16.msra.mxu0 %v2497_v56  ;;  %2280 = vmatpush3.bf16.msra.mxu1 %v2512_v9  ;;  %v2519_v56 = vld [vmem:[%s3218_s9] sm:$0xff]  }
 0x1e9   :  { %2250 = vmatprep.subr.bf16.mxu0 %v2498_v44  ;;  %2281 = vmatprep.subr.bf16.mxu1 %v2545_v6 }
 0x1ea   :  { %2295 = vmatprep.mubr.msk.bf16.mxu1 %vm2546_vm8, %v2545_v6 }
 0x1ec   :  { %2251 = vmatpush3.bf16.msra.mxu0 %v2499_v1  ;;  %2282 = vmatpush3.bf16.msra.mxu1 %v2513_v11 }
 0x1ed   :  { %2252 = vmatprep.subr.bf16.mxu0 %v2500_v4  ;;  %2283 = vmatprep.subr.bf16.mxu1 %v2545_v6 }
 0x1f0   :  { %2253 = vmatpush3.bf16.msra.mxu0 %v2501_v57  ;;  %2284 = vmatpush3.bf16.msra.mxu1 %v2514_v12  ;;  %v2213_v57 = vld [vmem:[%s3217_s8] ss:$0 sm:$0xff] }
 0x1f1   :  { %2254 = vmatprep.subr.bf16.mxu0 %v2502_v58  ;;  %2285 = vmatprep.subr.bf16.mxu1 %v2545_v6 }
 0x1f4   :  { %2255 = vmatpush3.bf16.msra.mxu0 %v2503_v59  ;;  %2286 = vmatpush3.bf16.msra.mxu1 %v2515_v13 }
 0x1f5   :  { %2256 = vmatprep.subr.bf16.mxu0 %v2504_v60  ;;  %2287 = vmatprep.subr.bf16.mxu1 %v2545_v6 }
 0x1f8   :  { %2257 = vmatpush3.bf16.msra.mxu0 %v2505_v61  ;;  %2288 = vmatpush3.bf16.msra.mxu1 %v2516_v40 }
 0x1f9   :  { %2258 = vmatprep.subr.bf16.mxu0 %v2506_v62  ;;  %2289 = vmatprep.subr.bf16.mxu1 %v2545_v6 }
 0x1fc   :  { %2259 = vmatpush3.bf16.msra.mxu0 %v2507_v63  ;;  %2290 = vmatpush3.bf16.msra.mxu1 %v2517_v47 }
 0x1fd   :  { %2260 = vmatprep.subr.bf16.mxu0 %v2508_v0  ;;  %2291 = vmatprep.subr.bf16.mxu1 %v2545_v6 }
 0x200   :  { %2261 = vmatpush3.bf16.msra.mxu0 %v2509_v5  ;;  %2292 = vmatpush3.bf16.msra.mxu1 %v2518_v55 }
 0x201   :  { %2262 = vmatprep.subr.bf16.mxu0 %v2510_v7  ;;  %2293 = vmatprep.subr.bf16.mxu1 %v2545_v6  ;;  %v2230_v6 = vld [vmem:[%s3219_s10] ss:$0 sm:$0xff] }
 0x204   :  { %2263 = vmatpush3.bf16.msra.mxu0 %v2511_v8  ;;  %2294 = vmatpush3.bf16.msra.mxu1 %v2519_v56 }
 0x267   :  { %v1291_v14 = vpop.f32.mrf.mxu0  ;;  %v1334_v15 = vpop.f32.mrf.mxu1 }
 0x268   :  { %v1335_v22 = vadd.f32 %v1334_v15, %v1291_v14 }
 0x269   :  { %v1293_v16 = vpop.f32.mrf.mxu0  ;;  %v1336_v17 = vpop.f32.mrf.mxu1 }
 0x26a   :  { %v1337_v25 = vadd.f32 %v1336_v17, %v1293_v16 }
 0x26b   :  { %v1295_v18 = vpop.f32.mrf.mxu0  ;;  %v1338_v19 = vpop.f32.mrf.mxu1 }
 0x26c   :  { %v1339_v29 = vadd.f32 %v1338_v19, %v1295_v18 }
 0x26d   :  { %v1297_v20 = vpop.f32.mrf.mxu0  ;;  %v1340_v21 = vpop.f32.mrf.mxu1 }
 0x26e   :  { %v1341_v34 = vadd.f32 %v1340_v21, %v1297_v20 }
 0x2a7   :  { %v1697_v23 = vpop.f32.mrf.mxu0  ;;  %v1740_v24 = vpop.f32.mrf.mxu1 }
 0x2a8   :  { %v1698_v26 = vadd.f32 %v1697_v23, %v1335_v22 }
 0x2a9   :  { %v1699_v27 = vpop.f32.mrf.mxu0  ;;  %v1742_v28 = vpop.f32.mrf.mxu1 }
 0x2aa   :  { %v1700_v31 = vadd.f32 %v1699_v27, %v1337_v25  ;;  %v1741_v36 = vadd.f32 %v1740_v24, %v1698_v26 }
 0x2ab   :  { %v1701_v32 = vpop.f32.mrf.mxu0  ;;  %v1744_v33 = vpop.f32.mrf.mxu1 }
 0x2ac   :  { %v1743_v2 = vadd.f32 %v1742_v28, %v1700_v31  ;;  %v1702_v35 = vadd.f32 %v1701_v32, %v1339_v29  ;;  %v1761_v48 = vadd.f32 %v1754_v37, %v1741_v36 }
 0x2ad   :  { %v1703_v38 = vpop.f32.mrf.mxu0  ;;  %v1746_v42 = vpop.f32.mrf.mxu1 }
 0x2ae   :  { %v1745_v39 = vadd.f32 %v1744_v33, %v1702_v35  ;;  %v1704_v41 = vadd.f32 %v1703_v38, %v1341_v34  ;;  %v1762_v43 = vadd.f32 %v1758_v3, %v1743_v2  ;;  %v1765_v53 = vmax.f32 %v1761_v48, 0.0 }
 0x2b0   :  { %v1763_v45 = vadd.f32 %v1754_v37, %v1745_v39  ;;  %v1747_v46 = vadd.f32 %v1746_v42, %v1704_v41  ;;  %v1766_v51 = vmax.f32 %v1762_v43, 0.0 }
 0x2b2   :  { %v1764_v49 = vadd.f32 %v1758_v3, %v1747_v46  ;;  %v1767_v50 = vmax.f32 %v1763_v45, 0.0 }
 0x2b4   :  { %v1768_v52 = vmax.f32 %v1764_v49, 0.0  ;;  %v1769_v10 = vpack.c.bf16 %v1767_v50, %v1765_v53 }
 0x2b6   :  { %v1770_v54 = vpack.c.bf16 %v1768_v52, %v1766_v51 }
 0x2b8   :  { %1938 = vmatprep.mubr.bf16.mxu0 %v1770_v54 }
 0x2b9   :  { %1939 = vmatmul.mubr.bf16.vlgmr.msra.gmra.mxu0 %v1769_v10 }
 0x379   :  { %v2264_v44 = vpop.f32.mrf.mxu0 }
 0x37b   :  { %v2265_v1 = vpop.f32.mrf.mxu0 }
 0x37c   :  { %v2266_v4 = vadd.f32 %v2265_v1, %v2264_v44 }
 0x37d   :  { %v2267_v58 = vpop.f32.mrf.mxu0 }
 0x37e   :  { %v1941_v60 = vadd.f32 %v2266_v4, %v2213_v57 }
 0x37f   :  { %v2268_v59 = vpop.f32.mrf.mxu0 }
 0x380   :  { %v2269_v61 = vadd.f32 %v2268_v59, %v2267_v58  ;;  %v1947_v63 = vmax.f32 %v1941_v60, 0.0 }
 0x382   :  { %v1944_v62 = vadd.f32 %v2269_v61, %v2213_v57 }
 0x384   :  { %v1948_v0 = vmax.f32 %v1944_v62, 0.0 }
 0x386   :  { %v1949_v5 = vpack.c.bf16 %v1948_v0, %v1947_v63 }
 0x388   :  { %2296 = vmatmul.mubr.bf16.vlgmr.msra.gmra.mxu1 %v1949_v5 }
 0x448   :  { %v2055_v7 = vpop.f32.mrf.mxu1 }
 0x449   :  { %v2056_v11 = vadd.f32 %v2230_v6, %v2055_v7 }
 0x44a   :  { %v2297_v8 = vpop.f32.mrf.mxu1 }
 0x44c   :  { %v2058_v9 = vpop.f32.mrf.mxu1 }
 0x44d   :  { %v2059_v12 = vadd.f32 %v2230_v6, %v2058_v9 }
 0x44e   :  { %v2298_v13 = vpop.f32.mrf.mxu1 }
 0x44f   :  { %v2246_v14 = vpack.c.bf16 %v2059_v12, %v2056_v11 }
 0x451   :  { %2247 = vst [vmem:[%s3220_s11] sm:$0xff] %v2246_v14  }
 0x452   :  { %2076 = vsyncpa [#allocation3], 1 }

</bundles_post_ra>
